<compile_context>
chip_gen: v7x
topology: tpu7x:2x2x1
jax: 0.10.0
libtpu: 0.0.40
codegen_flags: <defaults>
</compile_context>

<pallas_src>
from functools import partial

import numpy as np
import jax
import jax.numpy as jnp
from jax.experimental import pallas as pl
from jax.experimental.pallas import tpu as pltpu

NEG_SLOPE = 0.1
F = 128                    # padded lane width for trunk / head activations
IN_W = 8                   # input lanes: 6 features, lane 6 = 1.0 (bias lane), lane 7 = 0
OUT_W = 128                # lane-dense output: means in lanes 0:8, stds in 8:16
NHIDDEN = 10               # linspace(10, 100, 10) -> 10, 20, ..., 100
N_HIDDEN_MM = NHIDDEN - 1  # 9 hidden (128,128) matmuls after the input layer
TILE_B_CHOICES = (128, 512, 2048)
MACS_PER_ROW = IN_W * F + N_HIDDEN_MM * F * F + F * F + F * OUT_W


def _leaky(x):
    # leaky_relu(x, 0.1) == max(x, 0.1*x) since 0.1 < 1  (mul+max, no select)
    return jnp.maximum(x, NEG_SLOPE * x)


def p3d_kernel(x_ref, w0_ref, hw_ref, hw1_ref, hw2_ref, out_ref):
    """One batch tile (split into two interleaved halves) through the net."""
    tb = x_ref.shape[0]
    half = tb // 2
    bf = jnp.bfloat16
    f32 = jnp.float32

    w0 = w0_ref[...]
    hw1 = hw1_ref[...]
    hw2 = hw2_ref[...]

    # Two independent half-tiles: one half's leaky epilogue overlaps the other
    # half's MXU pushes (dependent-chain latency hiding).
    h = [x_ref[0:half, :].astype(bf), x_ref[half:tb, :].astype(bf)]

    # Input layer (bias folded via the constant-1 input lane; establishes the
    # ones lane at column 127 of the activation).
    acc = [jnp.dot(hi, w0, preferred_element_type=f32) for hi in h]
    h = [_leaky(a) for a in acc]

    # Hidden trunk: 9 dependent (128,128) bf16 matmuls, fully unrolled.
    for i in range(N_HIDDEN_MM):
        wi = hw_ref[i]
        acc = [jnp.dot(hi.astype(bf), wi, preferred_element_type=f32) for hi in h]
        h = [_leaky(a) for a in acc]

    # Fused heads, layer 1: means -> lanes 0:50, stds -> lanes 64:114.
    acc = [jnp.dot(hi.astype(bf), hw1, preferred_element_type=f32) for hi in h]
    h = [_leaky(a) for a in acc]

    # Fused heads, layer 2: lane-dense (128,128) weight; means 0:8, stds 8:16.
    out = [jnp.dot(hi.astype(bf), hw2, preferred_element_type=f32) for hi in h]
    out_ref[0:half, :] = out[0]
    out_ref[half:tb, :] = out[1]


def make_params(key, nhidden=NHIDDEN):
    """Deterministic synthetic parameters matching the torch module's shapes."""
    sizes = [6, 10] + [int(v) for v in np.linspace(10, 100, nhidden)][1:]
    params = {"trunk": [], "means": [], "stds": []}
    for din, dout in zip(sizes[:-1], sizes[1:]):
        key, kw, kb = jax.random.split(key, 3)
        w = jax.random.normal(kw, (din, dout), jnp.float32) * (1.4 / np.sqrt(din))
        b = jax.random.normal(kb, (dout,), jnp.float32) * 0.1
        params["trunk"].append((w, b))
    for head in ("means", "stds"):
        for din, dout in [(100, 50), (50, 8)]:
            key, kw, kb = jax.random.split(key, 3)
            w = jax.random.normal(kw, (din, dout), jnp.float32) * (1.4 / np.sqrt(din))
            b = jax.random.normal(kb, (dout,), jnp.float32) * 0.1
            params[head].append((w, b))
    return params


def pack_params(params):
    """Pad/pack torch-shaped params into bf16 kernel tensors (once per model).

    Biases are folded into row 127 (row 6 for the input layer) of each weight;
    a constant-1 "ones lane" at column 127 is kept alive through every layer so
    the in-kernel epilogue is just the leaky ReLU.
    """
    trunk = params["trunk"]

    # Input layer (6,10) -> (8,128): rows 0:6 weights, row 6 bias + ones-lane seed.
    w0, b0 = trunk[0]
    W0 = jnp.zeros((IN_W, F), jnp.float32)
    W0 = W0.at[:6, :10].set(w0)
    W0 = W0.at[6, :10].set(b0)       # input lane 6 carries 1.0
    W0 = W0.at[6, 127].set(1.0)      # establish the ones lane

    # Hidden layers: stacked (9,128,128), bias in row 127, ones-lane passthrough.
    HW = jnp.zeros((N_HIDDEN_MM, F, F), jnp.float32)
    for i, (w, b) in enumerate(trunk[1:]):
        din, dout = w.shape
        HW = HW.at[i, :din, :dout].set(w)
        HW = HW.at[i, 127, :dout].set(b)
        HW = HW.at[i, 127, 127].set(1.0)

    (mw1, mb1), (mw2, mb2) = params["means"]
    (sw1, sb1), (sw2, sb2) = params["stds"]

    # Fused head layer 1: means -> cols 0:50, stds -> cols 64:114.
    HW1 = jnp.zeros((F, F), jnp.float32)
    HW1 = HW1.at[:100, 0:50].set(mw1).at[:100, 64:114].set(sw1)
    HW1 = HW1.at[127, 0:50].set(mb1).at[127, 64:114].set(sb1)
    HW1 = HW1.at[127, 127].set(1.0)

    # Fused head layer 2: lane-dense (128,128); means -> cols 0:8, stds -> 8:16.
    HW2 = jnp.zeros((F, OUT_W), jnp.float32)
    HW2 = HW2.at[0:50, 0:8].set(mw2).at[64:114, 8:16].set(sw2)
    HW2 = HW2.at[127, 0:8].set(mb2).at[127, 8:16].set(sb2)

    bf = jnp.bfloat16
    return dict(w0=W0.astype(bf), hw=HW.astype(bf),
                hw1=HW1.astype(bf), hw2=HW2.astype(bf))


def _resident(shape):
    """BlockSpec mapping every grid step to block 0 (weight stays VMEM-resident)."""
    zeros = (0,) * len(shape)
    return pl.BlockSpec(shape, lambda i, _z=zeros: _z)


@partial(jax.jit, static_argnames=("tile_b",))
def _run(inp, packed, tile_b):
    B = inp.shape[0]
    B_pad = pl.cdiv(B, tile_b) * tile_b

    # (B,6) features -> (B_pad,8): lane 6 carries the constant 1 used to fold
    # the biases into the weights; lane 7 is zero padding.
    x = jnp.concatenate(
        [inp.astype(jnp.float32),
         jnp.ones((B, 1), jnp.float32),
         jnp.zeros((B, 1), jnp.float32)], axis=1)
    x = jnp.pad(x, ((0, B_pad - B), (0, 0)))

    weight_bytes = sum(int(np.prod(v.shape)) * v.dtype.itemsize
                       for v in packed.values())
    cost = pl.CostEstimate(
        flops=2 * B_pad * MACS_PER_ROW,
        transcendentals=0,
        bytes_accessed=B_pad * (IN_W + OUT_W) * 4 + weight_bytes)

    out = pl.pallas_call(
        p3d_kernel,
        out_shape=jax.ShapeDtypeStruct((B_pad, OUT_W), jnp.float32),
        grid=(B_pad // tile_b,),
        in_specs=[
            pl.BlockSpec((tile_b, IN_W), lambda i: (i, 0)),  # x: tiled over batch
            _resident((IN_W, F)),                            # w0 (bf16)
            _resident((N_HIDDEN_MM, F, F)),                  # hidden weights (bf16)
            _resident((F, F)),                               # fused head-1 weight (bf16)
            _resident((F, OUT_W)),                           # fused head-2 weight (bf16)
        ],
        out_specs=pl.BlockSpec((tile_b, OUT_W), lambda i: (i, 0)),
        compiler_params=pltpu.CompilerParams(
            dimension_semantics=("parallel",),
            vmem_limit_bytes=32 * 1024 * 1024),
        cost_estimate=cost,
    )(x, packed["w0"], packed["hw"], packed["hw1"], packed["hw2"])

    return out[:B, 0:8], out[:B, 8:16]


def p3d_emuv0_forward(inp, packed, tile_b=None):
    """inp: (B, 6) float32 -> (coeffs (B, 8), logerr_coeffs (B, 8))."""
    B = inp.shape[0]
    if tile_b is None:
        tile_b = next((t for t in TILE_B_CHOICES if B <= t), TILE_B_CHOICES[-1])
    assert tile_b % 16 == 0, "tile_b must be a multiple of 16 (two 8-row halves)"
    return _run(inp, packed, tile_b)


def reference_f32(inp, params):
    """Pure-JAX f32 reference mirroring the torch forward."""
    h = inp.astype(jnp.float32)
    for w, b in params["trunk"]:
        h = _leaky(h @ w + b)
    (mw1, mb1), (mw2, mb2) = params["means"]
    (sw1, sb1), (sw2, sb2) = params["stds"]
    means = _leaky(h @ mw1 + mb1) @ mw2 + mb2
    stds = _leaky(h @ sw1 + sb1) @ sw2 + sb2
    return means, stds


def reference_bf16(inp, params):
    """Mirrors the kernel numerics: bf16 matmul operands, f32 accumulation,
    bf16-rounded biases, f32 leaky epilogue."""
    bf, f32 = jnp.bfloat16, jnp.float32

    def lin(h, w, b):
        return (jnp.dot(h.astype(bf), w.astype(bf), preferred_element_type=f32)
                + b.astype(bf).astype(f32))

    h = inp.astype(f32)
    for w, b in params["trunk"]:
        h = _leaky(lin(h, w, b))
    (mw1, mb1), (mw2, mb2) = params["means"]
    (sw1, sb1), (sw2, sb2) = params["stds"]
    means = lin(_leaky(lin(h, mw1, mb1)), mw2, mb2)
    stds = lin(_leaky(lin(h, sw1, sb1)), sw2, sb2)
    return means, stds


if __name__ == "__main__":
    key = jax.random.PRNGKey(0)
    kp, kx1, kx2 = jax.random.split(key, 3)
    params = make_params(kp, NHIDDEN)
    packed = pack_params(params)

    # Test 1: batch not a multiple of 8 (exercises padding), single grid step.
    B1 = 12
    inp1 = jax.random.normal(kx1, (B1, 6), jnp.float32)
    c1, l1 = p3d_emuv0_forward(inp1, packed)
    c1, l1 = jax.block_until_ready(c1), jax.block_until_ready(l1)
    assert c1.shape == (B1, 8) and l1.shape == (B1, 8)
    rc1, rl1 = reference_bf16(inp1, params)          # apples-to-apples numerics
    np.testing.assert_allclose(np.asarray(c1), np.asarray(rc1), rtol=1e-3, atol=1e-4)
    np.testing.assert_allclose(np.asarray(l1), np.asarray(rl1), rtol=1e-3, atol=1e-4)
    fc1, fl1 = reference_f32(inp1, params)           # loose semantic sanity check
    np.testing.assert_allclose(np.asarray(c1), np.asarray(fc1), rtol=2e-1, atol=1e-1)
    np.testing.assert_allclose(np.asarray(l1), np.asarray(fl1), rtol=2e-1, atol=1e-1)

    # Test 2: multi-step grid (tile_b=16 -> grid=(3,)); exercises the pipeline
    # and VMEM-resident weight revisiting across steps.
    B2 = 40
    inp2 = jax.random.normal(kx2, (B2, 6), jnp.float32)
    c2, l2 = p3d_emuv0_forward(inp2, packed, tile_b=16)
    c2, l2 = jax.block_until_ready(c2), jax.block_until_ready(l2)
    rc2, rl2 = reference_bf16(inp2, params)
    np.testing.assert_allclose(np.asarray(c2), np.asarray(rc2), rtol=1e-3, atol=1e-4)
    np.testing.assert_allclose(np.asarray(l2), np.asarray(rl2), rtol=1e-3, atol=1e-4)

    print("KERNEL_OK")
</pallas_src>

<mosaic_0001>
module attributes {stable_mosaic.version = 11 : i64} {
  func.func @p3d_kernel(%arg0: i32, %arg1: memref<128x8xf32, #tpu.memory_space<vmem>>, %arg2: memref<8x128xbf16, #tpu.memory_space<vmem>>, %arg3: memref<9x128x128xbf16, #tpu.memory_space<vmem>>, %arg4: memref<128x128xbf16, #tpu.memory_space<vmem>>, %arg5: memref<128x128xbf16, #tpu.memory_space<vmem>>, %arg6: memref<128x128xf32, #tpu.memory_space<vmem>>) attributes {dimension_semantics = [#tpu.dimension_semantics<parallel>], iteration_bounds = array<i64: 1>, scalar_prefetch = 0 : i64, scratch_operands = 0 : i64, tpu.core_type = #tpu.core_type<tc>, window_params = [{transform_indices = @transform_0, window_bounds = array<i64: 128, 8>}, {pipeline_mode = #tpu.pipeline_mode<synchronous>, transform_indices = @transform_1, window_bounds = array<i64: 8, 128>}, {pipeline_mode = #tpu.pipeline_mode<synchronous>, transform_indices = @transform_2, window_bounds = array<i64: 9, 128, 128>}, {pipeline_mode = #tpu.pipeline_mode<synchronous>, transform_indices = @transform_3, window_bounds = array<i64: 128, 128>}, {pipeline_mode = #tpu.pipeline_mode<synchronous>, transform_indices = @transform_4, window_bounds = array<i64: 128, 128>}, {transform_indices = @transform_5, window_bounds = array<i64: 128, 128>}]} {
    %c0 = arith.constant 0 : index
    %c0_0 = arith.constant 0 : index
    %0 = vector.load %arg2[%c0, %c0_0] : memref<8x128xbf16, #tpu.memory_space<vmem>>, vector<8x128xbf16>
    %c0_1 = arith.constant 0 : index
    %c0_2 = arith.constant 0 : index
    %1 = vector.load %arg4[%c0_1, %c0_2] : memref<128x128xbf16, #tpu.memory_space<vmem>>, vector<128x128xbf16>
    %c0_3 = arith.constant 0 : index
    %c0_4 = arith.constant 0 : index
    %2 = vector.load %arg5[%c0_3, %c0_4] : memref<128x128xbf16, #tpu.memory_space<vmem>>, vector<128x128xbf16>
    %c0_5 = arith.constant 0 : index
    %c0_6 = arith.constant 0 : index
    %3 = vector.load %arg1[%c0_5, %c0_6] : memref<128x8xf32, #tpu.memory_space<vmem>>, vector<64x8xf32>
    %4 = arith.truncf %3 : vector<64x8xf32> to vector<64x8xbf16>
    %c64 = arith.constant 64 : index
    %c0_7 = arith.constant 0 : index
    %5 = vector.load %arg1[%c64, %c0_7] : memref<128x8xf32, #tpu.memory_space<vmem>>, vector<64x8xf32>
    %6 = arith.truncf %5 : vector<64x8xf32> to vector<64x8xbf16>
    %cst = arith.constant dense<0.000000e+00> : vector<64x128xf32>
    %7 = tpu.matmul %4, %0, %cst {dimension_numbers = #tpu.dot_dimension_numbers<[1], [0], [0], [1], [0, 0, 1, 1], [], []>} : vector<64x8xbf16>, vector<8x128xbf16>, vector<64x128xf32> -> vector<64x128xf32>
    %cst_8 = arith.constant dense<0.000000e+00> : vector<64x128xf32>
    %8 = tpu.matmul %6, %0, %cst_8 {dimension_numbers = #tpu.dot_dimension_numbers<[1], [0], [0], [1], [0, 0, 1, 1], [], []>} : vector<64x8xbf16>, vector<8x128xbf16>, vector<64x128xf32> -> vector<64x128xf32>
    %cst_9 = arith.constant 1.000000e-01 : f32
    %9 = vector.broadcast %cst_9 : f32 to vector<64x128xf32>
    %10 = arith.mulf %9, %7 : vector<64x128xf32>
    %11 = arith.maximumf %7, %10 : vector<64x128xf32>
    %cst_10 = arith.constant 1.000000e-01 : f32
    %12 = vector.broadcast %cst_10 : f32 to vector<64x128xf32>
    %13 = arith.mulf %12, %8 : vector<64x128xf32>
    %14 = arith.maximumf %8, %13 : vector<64x128xf32>
    %c0_11 = arith.constant 0 : index
    %c0_12 = arith.constant 0 : index
    %c0_13 = arith.constant 0 : index
    %15 = vector.load %arg3[%c0_11, %c0_12, %c0_13] : memref<9x128x128xbf16, #tpu.memory_space<vmem>>, vector<1x128x128xbf16>
    %16 = vector.shape_cast %15 : vector<1x128x128xbf16> to vector<128x128xbf16>
    %17 = arith.truncf %11 : vector<64x128xf32> to vector<64x128xbf16>
    %cst_14 = arith.constant dense<0.000000e+00> : vector<64x128xf32>
    %18 = tpu.matmul %17, %16, %cst_14 {dimension_numbers = #tpu.dot_dimension_numbers<[1], [0], [0], [1], [0, 0, 1, 1], [], []>} : vector<64x128xbf16>, vector<128x128xbf16>, vector<64x128xf32> -> vector<64x128xf32>
    %19 = arith.truncf %14 : vector<64x128xf32> to vector<64x128xbf16>
    %cst_15 = arith.constant dense<0.000000e+00> : vector<64x128xf32>
    %20 = tpu.matmul %19, %16, %cst_15 {dimension_numbers = #tpu.dot_dimension_numbers<[1], [0], [0], [1], [0, 0, 1, 1], [], []>} : vector<64x128xbf16>, vector<128x128xbf16>, vector<64x128xf32> -> vector<64x128xf32>
    %cst_16 = arith.constant 1.000000e-01 : f32
    %21 = vector.broadcast %cst_16 : f32 to vector<64x128xf32>
    %22 = arith.mulf %21, %18 : vector<64x128xf32>
    %23 = arith.maximumf %18, %22 : vector<64x128xf32>
    %cst_17 = arith.constant 1.000000e-01 : f32
    %24 = vector.broadcast %cst_17 : f32 to vector<64x128xf32>
    %25 = arith.mulf %24, %20 : vector<64x128xf32>
    %26 = arith.maximumf %20, %25 : vector<64x128xf32>
    %c1 = arith.constant 1 : index
    %c0_18 = arith.constant 0 : index
    %c0_19 = arith.constant 0 : index
    %27 = vector.load %arg3[%c1, %c0_18, %c0_19] : memref<9x128x128xbf16, #tpu.memory_space<vmem>>, vector<1x128x128xbf16>
    %28 = vector.shape_cast %27 : vector<1x128x128xbf16> to vector<128x128xbf16>
    %29 = arith.truncf %23 : vector<64x128xf32> to vector<64x128xbf16>
    %cst_20 = arith.constant dense<0.000000e+00> : vector<64x128xf32>
    %30 = tpu.matmul %29, %28, %cst_20 {dimension_numbers = #tpu.dot_dimension_numbers<[1], [0], [0], [1], [0, 0, 1, 1], [], []>} : vector<64x128xbf16>, vector<128x128xbf16>, vector<64x128xf32> -> vector<64x128xf32>
    %31 = arith.truncf %26 : vector<64x128xf32> to vector<64x128xbf16>
    %cst_21 = arith.constant dense<0.000000e+00> : vector<64x128xf32>
    %32 = tpu.matmul %31, %28, %cst_21 {dimension_numbers = #tpu.dot_dimension_numbers<[1], [0], [0], [1], [0, 0, 1, 1], [], []>} : vector<64x128xbf16>, vector<128x128xbf16>, vector<64x128xf32> -> vector<64x128xf32>
    %cst_22 = arith.constant 1.000000e-01 : f32
    %33 = vector.broadcast %cst_22 : f32 to vector<64x128xf32>
    %34 = arith.mulf %33, %30 : vector<64x128xf32>
    %35 = arith.maximumf %30, %34 : vector<64x128xf32>
    %cst_23 = arith.constant 1.000000e-01 : f32
    %36 = vector.broadcast %cst_23 : f32 to vector<64x128xf32>
    %37 = arith.mulf %36, %32 : vector<64x128xf32>
    %38 = arith.maximumf %32, %37 : vector<64x128xf32>
    %c2 = arith.constant 2 : index
    %c0_24 = arith.constant 0 : index
    %c0_25 = arith.constant 0 : index
    %39 = vector.load %arg3[%c2, %c0_24, %c0_25] : memref<9x128x128xbf16, #tpu.memory_space<vmem>>, vector<1x128x128xbf16>
    %40 = vector.shape_cast %39 : vector<1x128x128xbf16> to vector<128x128xbf16>
    %41 = arith.truncf %35 : vector<64x128xf32> to vector<64x128xbf16>
    %cst_26 = arith.constant dense<0.000000e+00> : vector<64x128xf32>
    %42 = tpu.matmul %41, %40, %cst_26 {dimension_numbers = #tpu.dot_dimension_numbers<[1], [0], [0], [1], [0, 0, 1, 1], [], []>} : vector<64x128xbf16>, vector<128x128xbf16>, vector<64x128xf32> -> vector<64x128xf32>
    %43 = arith.truncf %38 : vector<64x128xf32> to vector<64x128xbf16>
    %cst_27 = arith.constant dense<0.000000e+00> : vector<64x128xf32>
    %44 = tpu.matmul %43, %40, %cst_27 {dimension_numbers = #tpu.dot_dimension_numbers<[1], [0], [0], [1], [0, 0, 1, 1], [], []>} : vector<64x128xbf16>, vector<128x128xbf16>, vector<64x128xf32> -> vector<64x128xf32>
    %cst_28 = arith.constant 1.000000e-01 : f32
    %45 = vector.broadcast %cst_28 : f32 to vector<64x128xf32>
    %46 = arith.mulf %45, %42 : vector<64x128xf32>
    %47 = arith.maximumf %42, %46 : vector<64x128xf32>
    %cst_29 = arith.constant 1.000000e-01 : f32
    %48 = vector.broadcast %cst_29 : f32 to vector<64x128xf32>
    %49 = arith.mulf %48, %44 : vector<64x128xf32>
    %50 = arith.maximumf %44, %49 : vector<64x128xf32>
    %c3 = arith.constant 3 : index
    %c0_30 = arith.constant 0 : index
    %c0_31 = arith.constant 0 : index
    %51 = vector.load %arg3[%c3, %c0_30, %c0_31] : memref<9x128x128xbf16, #tpu.memory_space<vmem>>, vector<1x128x128xbf16>
    %52 = vector.shape_cast %51 : vector<1x128x128xbf16> to vector<128x128xbf16>
    %53 = arith.truncf %47 : vector<64x128xf32> to vector<64x128xbf16>
    %cst_32 = arith.constant dense<0.000000e+00> : vector<64x128xf32>
    %54 = tpu.matmul %53, %52, %cst_32 {dimension_numbers = #tpu.dot_dimension_numbers<[1], [0], [0], [1], [0, 0, 1, 1], [], []>} : vector<64x128xbf16>, vector<128x128xbf16>, vector<64x128xf32> -> vector<64x128xf32>
    %55 = arith.truncf %50 : vector<64x128xf32> to vector<64x128xbf16>
    %cst_33 = arith.constant dense<0.000000e+00> : vector<64x128xf32>
    %56 = tpu.matmul %55, %52, %cst_33 {dimension_numbers = #tpu.dot_dimension_numbers<[1], [0], [0], [1], [0, 0, 1, 1], [], []>} : vector<64x128xbf16>, vector<128x128xbf16>, vector<64x128xf32> -> vector<64x128xf32>
    %cst_34 = arith.constant 1.000000e-01 : f32
    %57 = vector.broadcast %cst_34 : f32 to vector<64x128xf32>
    %58 = arith.mulf %57, %54 : vector<64x128xf32>
    %59 = arith.maximumf %54, %58 : vector<64x128xf32>
    %cst_35 = arith.constant 1.000000e-01 : f32
    %60 = vector.broadcast %cst_35 : f32 to vector<64x128xf32>
    %61 = arith.mulf %60, %56 : vector<64x128xf32>
    %62 = arith.maximumf %56, %61 : vector<64x128xf32>
    %c4 = arith.constant 4 : index
    %c0_36 = arith.constant 0 : index
    %c0_37 = arith.constant 0 : index
    %63 = vector.load %arg3[%c4, %c0_36, %c0_37] : memref<9x128x128xbf16, #tpu.memory_space<vmem>>, vector<1x128x128xbf16>
    %64 = vector.shape_cast %63 : vector<1x128x128xbf16> to vector<128x128xbf16>
    %65 = arith.truncf %59 : vector<64x128xf32> to vector<64x128xbf16>
    %cst_38 = arith.constant dense<0.000000e+00> : vector<64x128xf32>
    %66 = tpu.matmul %65, %64, %cst_38 {dimension_numbers = #tpu.dot_dimension_numbers<[1], [0], [0], [1], [0, 0, 1, 1], [], []>} : vector<64x128xbf16>, vector<128x128xbf16>, vector<64x128xf32> -> vector<64x128xf32>
    %67 = arith.truncf %62 : vector<64x128xf32> to vector<64x128xbf16>
    %cst_39 = arith.constant dense<0.000000e+00> : vector<64x128xf32>
    %68 = tpu.matmul %67, %64, %cst_39 {dimension_numbers = #tpu.dot_dimension_numbers<[1], [0], [0], [1], [0, 0, 1, 1], [], []>} : vector<64x128xbf16>, vector<128x128xbf16>, vector<64x128xf32> -> vector<64x128xf32>
    %cst_40 = arith.constant 1.000000e-01 : f32
    %69 = vector.broadcast %cst_40 : f32 to vector<64x128xf32>
    %70 = arith.mulf %69, %66 : vector<64x128xf32>
    %71 = arith.maximumf %66, %70 : vector<64x128xf32>
    %cst_41 = arith.constant 1.000000e-01 : f32
    %72 = vector.broadcast %cst_41 : f32 to vector<64x128xf32>
    %73 = arith.mulf %72, %68 : vector<64x128xf32>
    %74 = arith.maximumf %68, %73 : vector<64x128xf32>
    %c5 = arith.constant 5 : index
    %c0_42 = arith.constant 0 : index
    %c0_43 = arith.constant 0 : index
    %75 = vector.load %arg3[%c5, %c0_42, %c0_43] : memref<9x128x128xbf16, #tpu.memory_space<vmem>>, vector<1x128x128xbf16>
    %76 = vector.shape_cast %75 : vector<1x128x128xbf16> to vector<128x128xbf16>
    %77 = arith.truncf %71 : vector<64x128xf32> to vector<64x128xbf16>
    %cst_44 = arith.constant dense<0.000000e+00> : vector<64x128xf32>
    %78 = tpu.matmul %77, %76, %cst_44 {dimension_numbers = #tpu.dot_dimension_numbers<[1], [0], [0], [1], [0, 0, 1, 1], [], []>} : vector<64x128xbf16>, vector<128x128xbf16>, vector<64x128xf32> -> vector<64x128xf32>
    %79 = arith.truncf %74 : vector<64x128xf32> to vector<64x128xbf16>
    %cst_45 = arith.constant dense<0.000000e+00> : vector<64x128xf32>
    %80 = tpu.matmul %79, %76, %cst_45 {dimension_numbers = #tpu.dot_dimension_numbers<[1], [0], [0], [1], [0, 0, 1, 1], [], []>} : vector<64x128xbf16>, vector<128x128xbf16>, vector<64x128xf32> -> vector<64x128xf32>
    %cst_46 = arith.constant 1.000000e-01 : f32
    %81 = vector.broadcast %cst_46 : f32 to vector<64x128xf32>
    %82 = arith.mulf %81, %78 : vector<64x128xf32>
    %83 = arith.maximumf %78, %82 : vector<64x128xf32>
    %cst_47 = arith.constant 1.000000e-01 : f32
    %84 = vector.broadcast %cst_47 : f32 to vector<64x128xf32>
    %85 = arith.mulf %84, %80 : vector<64x128xf32>
    %86 = arith.maximumf %80, %85 : vector<64x128xf32>
    %c6 = arith.constant 6 : index
    %c0_48 = arith.constant 0 : index
    %c0_49 = arith.constant 0 : index
    %87 = vector.load %arg3[%c6, %c0_48, %c0_49] : memref<9x128x128xbf16, #tpu.memory_space<vmem>>, vector<1x128x128xbf16>
    %88 = vector.shape_cast %87 : vector<1x128x128xbf16> to vector<128x128xbf16>
    %89 = arith.truncf %83 : vector<64x128xf32> to vector<64x128xbf16>
    %cst_50 = arith.constant dense<0.000000e+00> : vector<64x128xf32>
    %90 = tpu.matmul %89, %88, %cst_50 {dimension_numbers = #tpu.dot_dimension_numbers<[1], [0], [0], [1], [0, 0, 1, 1], [], []>} : vector<64x128xbf16>, vector<128x128xbf16>, vector<64x128xf32> -> vector<64x128xf32>
    %91 = arith.truncf %86 : vector<64x128xf32> to vector<64x128xbf16>
    %cst_51 = arith.constant dense<0.000000e+00> : vector<64x128xf32>
    %92 = tpu.matmul %91, %88, %cst_51 {dimension_numbers = #tpu.dot_dimension_numbers<[1], [0], [0], [1], [0, 0, 1, 1], [], []>} : vector<64x128xbf16>, vector<128x128xbf16>, vector<64x128xf32> -> vector<64x128xf32>
    %cst_52 = arith.constant 1.000000e-01 : f32
    %93 = vector.broadcast %cst_52 : f32 to vector<64x128xf32>
    %94 = arith.mulf %93, %90 : vector<64x128xf32>
    %95 = arith.maximumf %90, %94 : vector<64x128xf32>
    %cst_53 = arith.constant 1.000000e-01 : f32
    %96 = vector.broadcast %cst_53 : f32 to vector<64x128xf32>
    %97 = arith.mulf %96, %92 : vector<64x128xf32>
    %98 = arith.maximumf %92, %97 : vector<64x128xf32>
    %c7 = arith.constant 7 : index
    %c0_54 = arith.constant 0 : index
    %c0_55 = arith.constant 0 : index
    %99 = vector.load %arg3[%c7, %c0_54, %c0_55] : memref<9x128x128xbf16, #tpu.memory_space<vmem>>, vector<1x128x128xbf16>
    %100 = vector.shape_cast %99 : vector<1x128x128xbf16> to vector<128x128xbf16>
    %101 = arith.truncf %95 : vector<64x128xf32> to vector<64x128xbf16>
    %cst_56 = arith.constant dense<0.000000e+00> : vector<64x128xf32>
    %102 = tpu.matmul %101, %100, %cst_56 {dimension_numbers = #tpu.dot_dimension_numbers<[1], [0], [0], [1], [0, 0, 1, 1], [], []>} : vector<64x128xbf16>, vector<128x128xbf16>, vector<64x128xf32> -> vector<64x128xf32>
    %103 = arith.truncf %98 : vector<64x128xf32> to vector<64x128xbf16>
    %cst_57 = arith.constant dense<0.000000e+00> : vector<64x128xf32>
    %104 = tpu.matmul %103, %100, %cst_57 {dimension_numbers = #tpu.dot_dimension_numbers<[1], [0], [0], [1], [0, 0, 1, 1], [], []>} : vector<64x128xbf16>, vector<128x128xbf16>, vector<64x128xf32> -> vector<64x128xf32>
    %cst_58 = arith.constant 1.000000e-01 : f32
    %105 = vector.broadcast %cst_58 : f32 to vector<64x128xf32>
    %106 = arith.mulf %105, %102 : vector<64x128xf32>
    %107 = arith.maximumf %102, %106 : vector<64x128xf32>
    %cst_59 = arith.constant 1.000000e-01 : f32
    %108 = vector.broadcast %cst_59 : f32 to vector<64x128xf32>
    %109 = arith.mulf %108, %104 : vector<64x128xf32>
    %110 = arith.maximumf %104, %109 : vector<64x128xf32>
    %c8 = arith.constant 8 : index
    %c0_60 = arith.constant 0 : index
    %c0_61 = arith.constant 0 : index
    %111 = vector.load %arg3[%c8, %c0_60, %c0_61] : memref<9x128x128xbf16, #tpu.memory_space<vmem>>, vector<1x128x128xbf16>
    %112 = vector.shape_cast %111 : vector<1x128x128xbf16> to vector<128x128xbf16>
    %113 = arith.truncf %107 : vector<64x128xf32> to vector<64x128xbf16>
    %cst_62 = arith.constant dense<0.000000e+00> : vector<64x128xf32>
    %114 = tpu.matmul %113, %112, %cst_62 {dimension_numbers = #tpu.dot_dimension_numbers<[1], [0], [0], [1], [0, 0, 1, 1], [], []>} : vector<64x128xbf16>, vector<128x128xbf16>, vector<64x128xf32> -> vector<64x128xf32>
    %115 = arith.truncf %110 : vector<64x128xf32> to vector<64x128xbf16>
    %cst_63 = arith.constant dense<0.000000e+00> : vector<64x128xf32>
    %116 = tpu.matmul %115, %112, %cst_63 {dimension_numbers = #tpu.dot_dimension_numbers<[1], [0], [0], [1], [0, 0, 1, 1], [], []>} : vector<64x128xbf16>, vector<128x128xbf16>, vector<64x128xf32> -> vector<64x128xf32>
    %cst_64 = arith.constant 1.000000e-01 : f32
    %117 = vector.broadcast %cst_64 : f32 to vector<64x128xf32>
    %118 = arith.mulf %117, %114 : vector<64x128xf32>
    %119 = arith.maximumf %114, %118 : vector<64x128xf32>
    %cst_65 = arith.constant 1.000000e-01 : f32
    %120 = vector.broadcast %cst_65 : f32 to vector<64x128xf32>
    %121 = arith.mulf %120, %116 : vector<64x128xf32>
    %122 = arith.maximumf %116, %121 : vector<64x128xf32>
    %123 = arith.truncf %119 : vector<64x128xf32> to vector<64x128xbf16>
    %cst_66 = arith.constant dense<0.000000e+00> : vector<64x128xf32>
    %124 = tpu.matmul %123, %1, %cst_66 {dimension_numbers = #tpu.dot_dimension_numbers<[1], [0], [0], [1], [0, 0, 1, 1], [], []>} : vector<64x128xbf16>, vector<128x128xbf16>, vector<64x128xf32> -> vector<64x128xf32>
    %125 = arith.truncf %122 : vector<64x128xf32> to vector<64x128xbf16>
    %cst_67 = arith.constant dense<0.000000e+00> : vector<64x128xf32>
    %126 = tpu.matmul %125, %1, %cst_67 {dimension_numbers = #tpu.dot_dimension_numbers<[1], [0], [0], [1], [0, 0, 1, 1], [], []>} : vector<64x128xbf16>, vector<128x128xbf16>, vector<64x128xf32> -> vector<64x128xf32>
    %cst_68 = arith.constant 1.000000e-01 : f32
    %127 = vector.broadcast %cst_68 : f32 to vector<64x128xf32>
    %128 = arith.mulf %127, %124 : vector<64x128xf32>
    %129 = arith.maximumf %124, %128 : vector<64x128xf32>
    %cst_69 = arith.constant 1.000000e-01 : f32
    %130 = vector.broadcast %cst_69 : f32 to vector<64x128xf32>
    %131 = arith.mulf %130, %126 : vector<64x128xf32>
    %132 = arith.maximumf %126, %131 : vector<64x128xf32>
    %133 = arith.truncf %129 : vector<64x128xf32> to vector<64x128xbf16>
    %cst_70 = arith.constant dense<0.000000e+00> : vector<64x128xf32>
    %134 = tpu.matmul %133, %2, %cst_70 {dimension_numbers = #tpu.dot_dimension_numbers<[1], [0], [0], [1], [0, 0, 1, 1], [], []>} : vector<64x128xbf16>, vector<128x128xbf16>, vector<64x128xf32> -> vector<64x128xf32>
    %135 = arith.truncf %132 : vector<64x128xf32> to vector<64x128xbf16>
    %cst_71 = arith.constant dense<0.000000e+00> : vector<64x128xf32>
    %136 = tpu.matmul %135, %2, %cst_71 {dimension_numbers = #tpu.dot_dimension_numbers<[1], [0], [0], [1], [0, 0, 1, 1], [], []>} : vector<64x128xbf16>, vector<128x128xbf16>, vector<64x128xf32> -> vector<64x128xf32>
    %c0_72 = arith.constant 0 : index
    %c0_73 = arith.constant 0 : index
    %137 = vector.load %arg6[%c0_72, %c0_73] : memref<128x128xf32, #tpu.memory_space<vmem>>, vector<64x128xf32>
    tpu.vector_store %arg6[%c0_72, %c0_73], %134 {strides = array<i32>} : memref<128x128xf32, #tpu.memory_space<vmem>>, vector<64x128xf32>,
    %c64_74 = arith.constant 64 : index
    %c0_75 = arith.constant 0 : index
    %138 = vector.load %arg6[%c64_74, %c0_75] : memref<128x128xf32, #tpu.memory_space<vmem>>, vector<64x128xf32>
    tpu.vector_store %arg6[%c64_74, %c0_75], %136 {strides = array<i32>} : memref<128x128xf32, #tpu.memory_space<vmem>>, vector<64x128xf32>,
    return
  }
  func.func @transform_0(%arg0: i32) -> (i32, i32) {
    %c0_i32 = arith.constant 0 : i32
    %c0_i32_0 = arith.constant 0 : i32
    return %arg0, %c0_i32 : i32, i32
  }
  func.func @transform_1(%arg0: i32) -> (i32, i32) {
    %c0_i32 = arith.constant 0 : i32
    %c0_i32_0 = arith.constant 0 : i32
    %c0_i32_1 = arith.constant 0 : i32
    return %c0_i32, %c0_i32_0 : i32, i32
  }
  func.func @transform_2(%arg0: i32) -> (i32, i32, i32) {
    %c0_i32 = arith.constant 0 : i32
    %c0_i32_0 = arith.constant 0 : i32
    %c0_i32_1 = arith.constant 0 : i32
    %c0_i32_2 = arith.constant 0 : i32
    return %c0_i32, %c0_i32_0, %c0_i32_1 : i32, i32, i32
  }
  func.func @transform_3(%arg0: i32) -> (i32, i32) {
    %c0_i32 = arith.constant 0 : i32
    %c0_i32_0 = arith.constant 0 : i32
    %c0_i32_1 = arith.constant 0 : i32
    return %c0_i32, %c0_i32_0 : i32, i32
  }
  func.func @transform_4(%arg0: i32) -> (i32, i32) {
    %c0_i32 = arith.constant 0 : i32
    %c0_i32_0 = arith.constant 0 : i32
    %c0_i32_1 = arith.constant 0 : i32
    return %c0_i32, %c0_i32_0 : i32, i32
  }
  func.func @transform_5(%arg0: i32) -> (i32, i32) {
    %c0_i32 = arith.constant 0 : i32
    %c0_i32_0 = arith.constant 0 : i32
    return %arg0, %c0_i32 : i32, i32
  }
}

</mosaic_0001>

<bundles_post_ra>
// kernel: _run.1
= control target key start
LH: loop header
LB: loop body
LE: loop exit
PB: predicated region body
PF: predicated region fallthrough
CT: control target
= control target key end

     0   :  { %10 = vsyncpa [#allocation3], 0  ;;  %s3857_s18 = smov [#allocation2]   ;;  %s4057_s0 = inlined_call_operand.vmem [shape: f32[128,8], index: 0, kind: input, shape index: {}]   ;;  %s4058_s1 = inlined_call_operand.vmem [shape: bf16[8,128], index: 1, kind: input, shape index: {}]   ;;  %s4059_s2 = inlined_call_operand.hbm [shape: bf16[9,128,128], index: 2, kind: input, shape index: {}]   ;;  %s4060_s3 = inlined_call_operand.vmem [shape: bf16[128,128], index: 3, kind: input, shape index: {}]   ;;  %s4061_s4 = inlined_call_operand.vmem [shape: bf16[128,128], index: 4, kind: input, shape index: {}]   ;;  %s4062_s5 = inlined_call_operand.vmem [shape: f32[128,128], index: 5, kind: output, shape index: {}]  }
   0x1   :  { %s20_s19 = sshll.u32 %s3857_s18, 4  ;;  %s3833_s22 = scalar_lea.hbm %s4059_s2, 9216  ;;  %s21_s19 = int_to_ptr.vmem [resolvable:$true] %s20_s19 }
   0x2   :  { %p3834_p0 = scmp.ne.s32.totalorder %s4059_s2, %s3833_s22  ;;  %p3837_p1 = scmp.lt.u32.totalorder %s3833_s22, %s4059_s2 }
   0x4   :  { %p3839_p2 = pnand %p3837_p1, %p3834_p0 }
   0x6   :  { %3842 = shalt.err (!%p3839_p2)
}
   0x7   :  { %s3843_s27 = scalar_lea.vmem %s21_s19, 9216  ;;  %p3848_p4 = scmp.lt.s32.totalorder %s21_s19, %s21_s19 }
   0x8   :  { %p3844_p3 = scmp.ne.s32.totalorder %s21_s19, %s3843_s27  ;;  %p3849_p5 = scmp.lt.s32.totalorder %s3843_s27, %s3843_s27 }
   0xa   :  { %p3850_p6 = por %p3849_p5, %p3848_p4 }
   0xc   :  { %p3851_p7 = pnand %p3850_p6, %p3844_p3 }
   0xe   :  { %3854 = shalt.err (!%p3851_p7)
}
   0xf   :  { %s3858_s28 = smov 64   ;;  %s3859_s29 = smov 4  }
  0x10   :  { %26 = dma.hbm_to_vmem [thread:$0]  %s4059_s2, 9216, %s21_s19, [#allocation3], %s3858_s28, %s3858_s28, %s3859_s29  }
  0x11   :  { %3855 = dma.done.wait [#allocation3], 9216  }
  0x12   :  { %3856 = vsyncadd [#allocation3], 4294958080  ;;  %vm105_vm0 = vcmask 1043456   ;;  %v35_v0 = vld [vmem:[%s4058_s1] sm:$0xf]  ;;  %v69_v2 = vld [vmem:[%s4057_s0 + $0x8] sm:$0xff] }
  0x13   :  { %v68_v1 = vld [vmem:[%s4057_s0] sm:$0xff]  ;;  %vm92_vm1 = vcmask 64512   ;;  %3740 = vmatprep.subr.msk.bf16.mxu0 %vm105_vm0, %v35_v0  ;;  %3741 = vmatprep.subr.msk.bf16.mxu1 %vm105_vm0, %v35_v0  ;;  %v107_v3 = vsel %vm105_vm0, %v35_v0, 0  ;;  %v81_v6 = vld [vmem:[%s4057_s0 + $0x48] sm:$0xff]  ;;  %v70_v7 = vld [vmem:[%s4057_s0 + $0x10] sm:$0xff] }
  0x14   :  { %v76_v4 = vpack.c.bf16 %v69_v2, %v68_v1  ;;  %v80_v5 = vld [vmem:[%s4057_s0 + $0x40] sm:$0xff]  ;;  %3193 = vmatpush3.bf16.msra.mxu0 %v107_v3  ;;  %3203 = vmatpush3.bf16.msra.mxu1 %v107_v3  ;;  %v71_v9 = vld [vmem:[%s4057_s0 + $0x18] sm:$0xff]  ;;  %v82_v10 = vld [vmem:[%s4057_s0 + $0x50] sm:$0xff] }
  0x15   :  { %v88_v8 = vpack.c.bf16 %v81_v6, %v80_v5  ;;  %v83_v11 = vld [vmem:[%s4057_s0 + $0x58] sm:$0xff]  ;;  %v77_v12 = vpack.c.bf16 %v71_v9, %v70_v7  ;;  %v72_v14 = vld [vmem:[%s4057_s0 + $0x20] sm:$0xff]  ;;  %v73_v15 = vld [vmem:[%s4057_s0 + $0x28] sm:$0xff] }
  0x16   :  { %3194 = vmatprep.mubr.msk.bf16.mxu0 %vm92_vm1, %v76_v4  ;;  %v89_v13 = vpack.c.bf16 %v83_v11, %v82_v10  ;;  %v84_v16 = vld [vmem:[%s4057_s0 + $0x60] sm:$0xff]  ;;  %v78_v17 = vpack.c.bf16 %v73_v15, %v72_v14  ;;  %v85_v18 = vld [vmem:[%s4057_s0 + $0x68] sm:$0xff]  ;;  %v74_v19 = vld [vmem:[%s4057_s0 + $0x30] sm:$0xff] }
  0x17   :  { %3204 = vmatprep.mubr.msk.bf16.mxu1 %vm92_vm1, %v88_v8  ;;  %v75_v20 = vld [vmem:[%s4057_s0 + $0x38] sm:$0xff]  ;;  %3195 = vmatmul.mubr.msk.bf16.vlgmr.msra.gmra.mrb[0].mxu0 %vm92_vm1, %v77_v12  ;;  %v90_v21 = vpack.c.bf16 %v85_v18, %v84_v16  ;;  %v86_v22 = vld [vmem:[%s4057_s0 + $0x70] sm:$0xff]  ;;  %v3745_v24 = vld [vmem:[#allocation2] sm:$0xff]  }
  0x18   :  { %3205 = vmatmul.mubr.msk.bf16.vlgmr.msra.gmra.mrb[0].mxu1 %vm92_vm1, %v89_v13  ;;  %v87_v23 = vld [vmem:[%s4057_s0 + $0x78] sm:$0xff]  ;;  %3198 = vmatprep.mubr.msk.bf16.mxu0 %vm92_vm1, %v78_v17  ;;  %v3746_v25 = vld [vmem:[#allocation2 + $0x8] sm:$0xff]   ;;  %v79_v26 = vpack.c.bf16 %v75_v20, %v74_v19  ;;  %v3747_v28 = vld [vmem:[#allocation2 + $0x10] sm:$0xff]  }
  0x19   :  { %3208 = vmatprep.mubr.msk.bf16.mxu1 %vm92_vm1, %v90_v21  ;;  %3212 = vmatprep.subr.bf16.mxu0 %v3745_v24  ;;  %v91_v27 = vpack.c.bf16 %v87_v23, %v86_v22  ;;  %v3748_v29 = vld [vmem:[#allocation2 + $0x18] sm:$0xff]   ;;  %v3749_v30 = vld [vmem:[#allocation2 + $0x20] sm:$0xff]   ;;  %v3750_v31 = vld [vmem:[#allocation2 + $0x28] sm:$0xff]  }
  0x1a   :  { %3236 = vmatprep.subr.bf16.mxu1 %v3745_v24  ;;  %3213 = vmatpush3.bf16.msra.mxu0 %v3745_v24  ;;  %v3751_v32 = vld [vmem:[#allocation2 + $0x30] sm:$0xff]   ;;  %v3752_v33 = vld [vmem:[#allocation2 + $0x38] sm:$0xff]   ;;  %v3753_v34 = vld [vmem:[#allocation2 + $0x40] sm:$0xff]  }
  0x1b   :  { %3237 = vmatpush3.bf16.msra.mxu1 %v3745_v24  ;;  %3214 = vmatprep.subr.bf16.mxu0 %v3746_v25  ;;  %v3754_v1 = vld [vmem:[#allocation2 + $0x48] sm:$0xff]   ;;  %v3755_v20 = vld [vmem:[#allocation2 + $0x50] sm:$0xff]  }
  0x1c   :  { %3238 = vmatprep.subr.bf16.mxu1 %v3746_v25 }
  0x1e   :  { %3215 = vmatpush3.bf16.msra.mxu0 %v3746_v25 }
  0x1f   :  { %3199 = vmatmul.mubr.msk.bf16.gmra.mrb[4].mxu0 %vm92_vm1, %v79_v26  ;;  %3239 = vmatpush3.bf16.msra.mxu1 %v3746_v25 }
  0x20   :  { %3209 = vmatmul.mubr.msk.bf16.gmra.mrb[4].mxu1 %vm92_vm1, %v91_v27  ;;  %3216 = vmatprep.subr.bf16.mxu0 %v3747_v28 }
  0x21   :  { %3240 = vmatprep.subr.bf16.mxu1 %v3747_v28 }
  0x22   :  { %3217 = vmatpush3.bf16.msra.mxu0 %v3747_v28 }
  0x23   :  { %3241 = vmatpush3.bf16.msra.mxu1 %v3747_v28  ;;  %3218 = vmatprep.subr.bf16.mxu0 %v3748_v29 }
  0x24   :  { %3242 = vmatprep.subr.bf16.mxu1 %v3748_v29 }
  0x26   :  { %3219 = vmatpush3.bf16.msra.mxu0 %v3748_v29 }
  0x27   :  { %3243 = vmatpush3.bf16.msra.mxu1 %v3748_v29  ;;  %3220 = vmatprep.subr.bf16.mxu0 %v3749_v30  ;;  %v3756_v29 = vld [vmem:[#allocation2 + $0x58] sm:$0xff]  }
  0x28   :  { %3244 = vmatprep.subr.bf16.mxu1 %v3749_v30 }
  0x2a   :  { %3221 = vmatpush3.bf16.msra.mxu0 %v3749_v30 }
  0x2b   :  { %3245 = vmatpush3.bf16.msra.mxu1 %v3749_v30  ;;  %3222 = vmatprep.subr.bf16.mxu0 %v3750_v31  ;;  %v3757_v30 = vld [vmem:[#allocation2 + $0x60] sm:$0xff]  }
  0x2c   :  { %3246 = vmatprep.subr.bf16.mxu1 %v3750_v31 }
  0x2e   :  { %3223 = vmatpush3.bf16.msra.mxu0 %v3750_v31 }
  0x2f   :  { %3247 = vmatpush3.bf16.msra.mxu1 %v3750_v31  ;;  %3224 = vmatprep.subr.bf16.mxu0 %v3751_v32  ;;  %v3758_v31 = vld [vmem:[#allocation2 + $0x68] sm:$0xff]  }
  0x30   :  { %3248 = vmatprep.subr.bf16.mxu1 %v3751_v32 }
  0x32   :  { %3225 = vmatpush3.bf16.msra.mxu0 %v3751_v32 }
  0x33   :  { %3249 = vmatpush3.bf16.msra.mxu1 %v3751_v32  ;;  %3226 = vmatprep.subr.bf16.mxu0 %v3752_v33  ;;  %v3759_v32 = vld [vmem:[#allocation2 + $0x70] sm:$0xff]  }
  0x34   :  { %3250 = vmatprep.subr.bf16.mxu1 %v3752_v33 }
  0x36   :  { %3227 = vmatpush3.bf16.msra.mxu0 %v3752_v33 }
  0x37   :  { %3251 = vmatpush3.bf16.msra.mxu1 %v3752_v33  ;;  %3260 = vmatprep.subr.bf16.mxu0 %v3753_v34  ;;  %v3760_v33 = vld [vmem:[#allocation2 + $0x78] sm:$0xff]  }
  0x38   :  { %3284 = vmatprep.subr.bf16.mxu1 %v3753_v34 }
  0xea   :  { %v3196_v35 = vpop.f32.mrb[0].mxu0 }
  0xeb   :  { %v3206_v36 = vpop.f32.mrb[0].mxu1  ;;  %v253_v37 = vmul.f32 0.1, %v3196_v35  ;;  %v143_v39 = vpop.f32.mrb[1].mxu0 }
  0xec   :  { %v269_v38 = vmul.f32 0.1, %v3206_v36  ;;  %v220_v40 = vpop.f32.mrb[1].mxu1  ;;  %v251_v41 = vmul.f32 0.1, %v143_v39  ;;  %v3197_v43 = vpop.f32.mrb[2].mxu0 }
  0xed   :  { %v267_v42 = vmul.f32 0.1, %v220_v40  ;;  %v3207_v44 = vpop.f32.mrb[2].mxu1  ;;  %v254_v45 = vmul.f32 0.1, %v3197_v43  ;;  %v146_v47 = vpop.f32.mrb[3].mxu0  ;;  %v261_v51 = vmax.f32 %v3196_v35, %v253_v37 }
  0xee   :  { %v270_v46 = vmul.f32 0.1, %v3207_v44  ;;  %v223_v48 = vpop.f32.mrb[3].mxu1  ;;  %v252_v49 = vmul.f32 0.1, %v146_v47  ;;  %v277_v52 = vmax.f32 %v3206_v36, %v269_v38  ;;  %v259_v55 = vmax.f32 %v143_v39, %v251_v41 }
  0xef   :  { %v268_v50 = vmul.f32 0.1, %v223_v48  ;;  %v262_v53 = vmax.f32 %v3197_v43, %v254_v45  ;;  %v275_v56 = vmax.f32 %v220_v40, %v267_v42 }
  0xf0   :  { %v278_v54 = vmax.f32 %v3207_v44, %v270_v46  ;;  %v260_v57 = vmax.f32 %v146_v47, %v252_v49 }
  0xf1   :  { %v276_v58 = vmax.f32 %v223_v48, %v268_v50  ;;  %v300_v59 = vpack.c.bf16 %v262_v53, %v261_v51 }
  0xf2   :  { %v417_v60 = vpack.c.bf16 %v278_v54, %v277_v52  ;;  %v299_v61 = vpack.c.bf16 %v260_v57, %v259_v55  ;;  %v3200_v63 = vpop.f32.mrb[4].mxu0 }
  0xf3   :  { %v416_v62 = vpack.c.bf16 %v276_v58, %v275_v56  ;;  %v3210_v0 = vpop.f32.mrb[4].mxu1  ;;  %v257_v2 = vmul.f32 0.1, %v3200_v63  ;;  %v159_v4 = vpop.f32.mrb[5].mxu0 }
  0xf4   :  { %v273_v3 = vmul.f32 0.1, %v3210_v0  ;;  %v236_v5 = vpop.f32.mrb[5].mxu1  ;;  %v255_v6 = vmul.f32 0.1, %v159_v4  ;;  %v3201_v8 = vpop.f32.mrb[6].mxu0  ;;  %3228 = vmatprep.mubr.bf16.mxu0 %v299_v61 }
  0xf5   :  { %v271_v7 = vmul.f32 0.1, %v236_v5  ;;  %v3211_v9 = vpop.f32.mrb[6].mxu1  ;;  %3252 = vmatprep.mubr.bf16.mxu1 %v416_v62  ;;  %v258_v10 = vmul.f32 0.1, %v3201_v8  ;;  %v162_v12 = vpop.f32.mrb[7].mxu0  ;;  %3229 = vmatmul.mubr.bf16.vlgmr.msra.gmra.mrb[8].mxu0 %v300_v59  ;;  %v265_v14 = vmax.f32 %v3200_v63, %v257_v2 }
  0xf6   :  { %v274_v11 = vmul.f32 0.1, %v3211_v9  ;;  %v239_v13 = vpop.f32.mrb[7].mxu1  ;;  %3253 = vmatmul.mubr.bf16.vlgmr.msra.gmra.mrb[8].mxu1 %v417_v60  ;;  %v256_v15 = vmul.f32 0.1, %v162_v12  ;;  %3261 = vmatpush3.bf16.msra.mxu0 %v3753_v34  ;;  %v281_v17 = vmax.f32 %v3210_v0, %v273_v3  ;;  %v263_v21 = vmax.f32 %v159_v4, %v255_v6 }
  0xf7   :  { %v272_v16 = vmul.f32 0.1, %v239_v13  ;;  %3285 = vmatpush3.bf16.msra.mxu1 %v3753_v34  ;;  %v266_v18 = vmax.f32 %v3201_v8, %v258_v10  ;;  %3262 = vmatprep.subr.bf16.mxu0 %v3754_v1  ;;  %v279_v22 = vmax.f32 %v236_v5, %v271_v7  ;;  %v3761_v34 = vld [vmem:[#allocation2 + $0x80] sm:$0xff]  }
  0xf8   :  { %v282_v19 = vmax.f32 %v3211_v9, %v274_v11  ;;  %3286 = vmatprep.subr.bf16.mxu1 %v3754_v1  ;;  %v264_v23 = vmax.f32 %v162_v12, %v256_v15 }
  0xf9   :  { %v280_v24 = vmax.f32 %v239_v13, %v272_v16  ;;  %v302_v25 = vpack.c.bf16 %v266_v18, %v265_v14 }
  0xfa   :  { %v419_v26 = vpack.c.bf16 %v282_v19, %v281_v17  ;;  %v301_v27 = vpack.c.bf16 %v264_v23, %v263_v21  ;;  %3263 = vmatpush3.bf16.msra.mxu0 %v3754_v1 }
  0xfb   :  { %v418_v28 = vpack.c.bf16 %v280_v24, %v279_v22  ;;  %3287 = vmatpush3.bf16.msra.mxu1 %v3754_v1  ;;  %3264 = vmatprep.subr.bf16.mxu0 %v3755_v20  ;;  %v3762_v1 = vld [vmem:[#allocation2 + $0x88] sm:$0xff]  }
  0xfc   :  { %3288 = vmatprep.subr.bf16.mxu1 %v3755_v20  ;;  %3232 = vmatprep.mubr.bf16.mxu0 %v301_v27 }
  0xfd   :  { %3256 = vmatprep.mubr.bf16.mxu1 %v418_v28  ;;  %3233 = vmatmul.mubr.bf16.gmra.mrb[12].mxu0 %v302_v25 }
  0xfe   :  { %3257 = vmatmul.mubr.bf16.gmra.mrb[12].mxu1 %v419_v26  ;;  %3265 = vmatpush3.bf16.msra.mxu0 %v3755_v20 }
  0xff   :  { %3289 = vmatpush3.bf16.msra.mxu1 %v3755_v20  ;;  %3266 = vmatprep.subr.bf16.mxu0 %v3756_v29  ;;  %v3763_v20 = vld [vmem:[#allocation2 + $0x90] sm:$0xff]  }
 0x100   :  { %3290 = vmatprep.subr.bf16.mxu1 %v3756_v29 }
 0x102   :  { %3267 = vmatpush3.bf16.msra.mxu0 %v3756_v29 }
 0x103   :  { %3291 = vmatpush3.bf16.msra.mxu1 %v3756_v29  ;;  %3268 = vmatprep.subr.bf16.mxu0 %v3757_v30  ;;  %v3764_v29 = vld [vmem:[#allocation2 + $0x98] sm:$0xff]  }
 0x104   :  { %3292 = vmatprep.subr.bf16.mxu1 %v3757_v30 }
 0x106   :  { %3269 = vmatpush3.bf16.msra.mxu0 %v3757_v30 }
 0x107   :  { %3293 = vmatpush3.bf16.msra.mxu1 %v3757_v30  ;;  %3270 = vmatprep.subr.bf16.mxu0 %v3758_v31  ;;  %v3765_v30 = vld [vmem:[#allocation2 + $0xa0] sm:$0xff]  }
 0x108   :  { %3294 = vmatprep.subr.bf16.mxu1 %v3758_v31 }
 0x10a   :  { %3271 = vmatpush3.bf16.msra.mxu0 %v3758_v31 }
 0x10b   :  { %3295 = vmatpush3.bf16.msra.mxu1 %v3758_v31  ;;  %3272 = vmatprep.subr.bf16.mxu0 %v3759_v32  ;;  %v3766_v31 = vld [vmem:[#allocation2 + $0xa8] sm:$0xff]  }
 0x10c   :  { %3296 = vmatprep.subr.bf16.mxu1 %v3759_v32 }
 0x10e   :  { %3273 = vmatpush3.bf16.msra.mxu0 %v3759_v32 }
 0x10f   :  { %3297 = vmatpush3.bf16.msra.mxu1 %v3759_v32  ;;  %3274 = vmatprep.subr.bf16.mxu0 %v3760_v33  ;;  %v3767_v32 = vld [vmem:[#allocation2 + $0xb0] sm:$0xff]  }
 0x110   :  { %3298 = vmatprep.subr.bf16.mxu1 %v3760_v33 }
 0x112   :  { %3275 = vmatpush3.bf16.msra.mxu0 %v3760_v33 }
 0x113   :  { %3299 = vmatpush3.bf16.msra.mxu1 %v3760_v33  ;;  %3308 = vmatprep.subr.bf16.mxu0 %v3761_v34  ;;  %v3768_v33 = vld [vmem:[#allocation2 + $0xb8] sm:$0xff]  }
 0x114   :  { %3332 = vmatprep.subr.bf16.mxu1 %v3761_v34 }
 0x1c8   :  { %v3230_v35 = vpop.f32.mrb[8].mxu0 }
 0x1c9   :  { %v3254_v36 = vpop.f32.mrb[8].mxu1  ;;  %v487_v37 = vmul.f32 0.1, %v3230_v35  ;;  %v385_v39 = vpop.f32.mrb[9].mxu0 }
 0x1ca   :  { %v503_v38 = vmul.f32 0.1, %v3254_v36  ;;  %v454_v40 = vpop.f32.mrb[9].mxu1  ;;  %v485_v41 = vmul.f32 0.1, %v385_v39  ;;  %v3231_v43 = vpop.f32.mrb[10].mxu0 }
 0x1cb   :  { %v501_v42 = vmul.f32 0.1, %v454_v40  ;;  %v3255_v44 = vpop.f32.mrb[10].mxu1  ;;  %v488_v45 = vmul.f32 0.1, %v3231_v43  ;;  %v388_v47 = vpop.f32.mrb[11].mxu0  ;;  %v495_v51 = vmax.f32 %v3230_v35, %v487_v37 }
 0x1cc   :  { %v504_v46 = vmul.f32 0.1, %v3255_v44  ;;  %v457_v48 = vpop.f32.mrb[11].mxu1  ;;  %v486_v49 = vmul.f32 0.1, %v388_v47  ;;  %v511_v52 = vmax.f32 %v3254_v36, %v503_v38  ;;  %v493_v55 = vmax.f32 %v385_v39, %v485_v41 }
 0x1cd   :  { %v502_v50 = vmul.f32 0.1, %v457_v48  ;;  %v496_v53 = vmax.f32 %v3231_v43, %v488_v45  ;;  %v509_v56 = vmax.f32 %v454_v40, %v501_v42 }
 0x1ce   :  { %v512_v54 = vmax.f32 %v3255_v44, %v504_v46  ;;  %v494_v57 = vmax.f32 %v388_v47, %v486_v49 }
 0x1cf   :  { %v510_v58 = vmax.f32 %v457_v48, %v502_v50  ;;  %v535_v59 = vpack.c.bf16 %v496_v53, %v495_v51 }
 0x1d0   :  { %v652_v60 = vpack.c.bf16 %v512_v54, %v511_v52  ;;  %v534_v61 = vpack.c.bf16 %v494_v57, %v493_v55  ;;  %v3234_v63 = vpop.f32.mrb[12].mxu0 }
 0x1d1   :  { %v651_v62 = vpack.c.bf16 %v510_v58, %v509_v56  ;;  %v3258_v0 = vpop.f32.mrb[12].mxu1  ;;  %v491_v2 = vmul.f32 0.1, %v3234_v63  ;;  %v401_v4 = vpop.f32.mrb[13].mxu0 }
 0x1d2   :  { %v507_v3 = vmul.f32 0.1, %v3258_v0  ;;  %v470_v5 = vpop.f32.mrb[13].mxu1  ;;  %v489_v6 = vmul.f32 0.1, %v401_v4  ;;  %v3235_v8 = vpop.f32.mrb[14].mxu0  ;;  %3276 = vmatprep.mubr.bf16.mxu0 %v534_v61 }
 0x1d3   :  { %v505_v7 = vmul.f32 0.1, %v470_v5  ;;  %v3259_v9 = vpop.f32.mrb[14].mxu1  ;;  %3300 = vmatprep.mubr.bf16.mxu1 %v651_v62  ;;  %v492_v10 = vmul.f32 0.1, %v3235_v8  ;;  %v404_v12 = vpop.f32.mrb[15].mxu0  ;;  %3277 = vmatmul.mubr.bf16.vlgmr.msra.gmra.mrb[16].mxu0 %v535_v59  ;;  %v499_v14 = vmax.f32 %v3234_v63, %v491_v2 }
 0x1d4   :  { %v508_v11 = vmul.f32 0.1, %v3259_v9  ;;  %v473_v13 = vpop.f32.mrb[15].mxu1  ;;  %3301 = vmatmul.mubr.bf16.vlgmr.msra.gmra.mrb[16].mxu1 %v652_v60  ;;  %v490_v15 = vmul.f32 0.1, %v404_v12  ;;  %3309 = vmatpush3.bf16.msra.mxu0 %v3761_v34  ;;  %v515_v17 = vmax.f32 %v3258_v0, %v507_v3  ;;  %v497_v21 = vmax.f32 %v401_v4, %v489_v6 }
 0x1d5   :  { %v506_v16 = vmul.f32 0.1, %v473_v13  ;;  %3333 = vmatpush3.bf16.msra.mxu1 %v3761_v34  ;;  %v500_v18 = vmax.f32 %v3235_v8, %v492_v10  ;;  %3310 = vmatprep.subr.bf16.mxu0 %v3762_v1  ;;  %v513_v22 = vmax.f32 %v470_v5, %v505_v7  ;;  %v3769_v34 = vld [vmem:[#allocation2 + $0xc0] sm:$0xff]  }
 0x1d6   :  { %v516_v19 = vmax.f32 %v3259_v9, %v508_v11  ;;  %3334 = vmatprep.subr.bf16.mxu1 %v3762_v1  ;;  %v498_v23 = vmax.f32 %v404_v12, %v490_v15 }
 0x1d7   :  { %v514_v24 = vmax.f32 %v473_v13, %v506_v16  ;;  %v537_v25 = vpack.c.bf16 %v500_v18, %v499_v14 }
 0x1d8   :  { %v654_v26 = vpack.c.bf16 %v516_v19, %v515_v17  ;;  %v536_v27 = vpack.c.bf16 %v498_v23, %v497_v21  ;;  %3311 = vmatpush3.bf16.msra.mxu0 %v3762_v1 }
 0x1d9   :  { %v653_v28 = vpack.c.bf16 %v514_v24, %v513_v22  ;;  %3335 = vmatpush3.bf16.msra.mxu1 %v3762_v1  ;;  %3312 = vmatprep.subr.bf16.mxu0 %v3763_v20  ;;  %v3770_v1 = vld [vmem:[#allocation2 + $0xc8] sm:$0xff]  }
 0x1da   :  { %3336 = vmatprep.subr.bf16.mxu1 %v3763_v20  ;;  %3280 = vmatprep.mubr.bf16.mxu0 %v536_v27 }
 0x1db   :  { %3304 = vmatprep.mubr.bf16.mxu1 %v653_v28  ;;  %3281 = vmatmul.mubr.bf16.gmra.mrb[20].mxu0 %v537_v25 }
 0x1dc   :  { %3305 = vmatmul.mubr.bf16.gmra.mrb[20].mxu1 %v654_v26  ;;  %3313 = vmatpush3.bf16.msra.mxu0 %v3763_v20 }
 0x1dd   :  { %3337 = vmatpush3.bf16.msra.mxu1 %v3763_v20  ;;  %3314 = vmatprep.subr.bf16.mxu0 %v3764_v29  ;;  %v3771_v20 = vld [vmem:[#allocation2 + $0xd0] sm:$0xff]  }
 0x1de   :  { %3338 = vmatprep.subr.bf16.mxu1 %v3764_v29 }
 0x1e0   :  { %3315 = vmatpush3.bf16.msra.mxu0 %v3764_v29 }
 0x1e1   :  { %3339 = vmatpush3.bf16.msra.mxu1 %v3764_v29  ;;  %3316 = vmatprep.subr.bf16.mxu0 %v3765_v30  ;;  %v3772_v29 = vld [vmem:[#allocation2 + $0xd8] sm:$0xff]  }
 0x1e2   :  { %3340 = vmatprep.subr.bf16.mxu1 %v3765_v30 }
 0x1e4   :  { %3317 = vmatpush3.bf16.msra.mxu0 %v3765_v30 }
 0x1e5   :  { %3341 = vmatpush3.bf16.msra.mxu1 %v3765_v30  ;;  %3318 = vmatprep.subr.bf16.mxu0 %v3766_v31  ;;  %v3773_v30 = vld [vmem:[#allocation2 + $0xe0] sm:$0xff]  }
 0x1e6   :  { %3342 = vmatprep.subr.bf16.mxu1 %v3766_v31 }
 0x1e8   :  { %3319 = vmatpush3.bf16.msra.mxu0 %v3766_v31 }
 0x1e9   :  { %3343 = vmatpush3.bf16.msra.mxu1 %v3766_v31  ;;  %3320 = vmatprep.subr.bf16.mxu0 %v3767_v32  ;;  %v3774_v31 = vld [vmem:[#allocation2 + $0xe8] sm:$0xff]  }
 0x1ea   :  { %3344 = vmatprep.subr.bf16.mxu1 %v3767_v32 }
 0x1ec   :  { %3321 = vmatpush3.bf16.msra.mxu0 %v3767_v32 }
 0x1ed   :  { %3345 = vmatpush3.bf16.msra.mxu1 %v3767_v32  ;;  %3322 = vmatprep.subr.bf16.mxu0 %v3768_v33  ;;  %v3775_v32 = vld [vmem:[#allocation2 + $0xf0] sm:$0xff]  }
 0x1ee   :  { %3346 = vmatprep.subr.bf16.mxu1 %v3768_v33 }
 0x1f0   :  { %3323 = vmatpush3.bf16.msra.mxu0 %v3768_v33 }
 0x1f1   :  { %3347 = vmatpush3.bf16.msra.mxu1 %v3768_v33  ;;  %3356 = vmatprep.subr.bf16.mxu0 %v3769_v34  ;;  %v3776_v33 = vld [vmem:[#allocation2 + $0xf8] sm:$0xff]  }
 0x1f2   :  { %3380 = vmatprep.subr.bf16.mxu1 %v3769_v34 }
 0x2a6   :  { %v3278_v35 = vpop.f32.mrb[16].mxu0 }
 0x2a7   :  { %v3302_v36 = vpop.f32.mrb[16].mxu1  ;;  %v722_v37 = vmul.f32 0.1, %v3278_v35  ;;  %v620_v39 = vpop.f32.mrb[17].mxu0 }
 0x2a8   :  { %v738_v38 = vmul.f32 0.1, %v3302_v36  ;;  %v689_v40 = vpop.f32.mrb[17].mxu1  ;;  %v720_v41 = vmul.f32 0.1, %v620_v39  ;;  %v3279_v43 = vpop.f32.mrb[18].mxu0 }
 0x2a9   :  { %v736_v42 = vmul.f32 0.1, %v689_v40  ;;  %v3303_v44 = vpop.f32.mrb[18].mxu1  ;;  %v723_v45 = vmul.f32 0.1, %v3279_v43  ;;  %v623_v47 = vpop.f32.mrb[19].mxu0  ;;  %v730_v51 = vmax.f32 %v3278_v35, %v722_v37 }
 0x2aa   :  { %v739_v46 = vmul.f32 0.1, %v3303_v44  ;;  %v692_v48 = vpop.f32.mrb[19].mxu1  ;;  %v721_v49 = vmul.f32 0.1, %v623_v47  ;;  %v746_v52 = vmax.f32 %v3302_v36, %v738_v38  ;;  %v728_v55 = vmax.f32 %v620_v39, %v720_v41 }
 0x2ab   :  { %v737_v50 = vmul.f32 0.1, %v692_v48  ;;  %v731_v53 = vmax.f32 %v3279_v43, %v723_v45  ;;  %v744_v56 = vmax.f32 %v689_v40, %v736_v42 }
 0x2ac   :  { %v747_v54 = vmax.f32 %v3303_v44, %v739_v46  ;;  %v729_v57 = vmax.f32 %v623_v47, %v721_v49 }
 0x2ad   :  { %v745_v58 = vmax.f32 %v692_v48, %v737_v50  ;;  %v770_v59 = vpack.c.bf16 %v731_v53, %v730_v51 }
 0x2ae   :  { %v887_v60 = vpack.c.bf16 %v747_v54, %v746_v52  ;;  %v769_v61 = vpack.c.bf16 %v729_v57, %v728_v55  ;;  %v3282_v63 = vpop.f32.mrb[20].mxu0 }
 0x2af   :  { %v886_v62 = vpack.c.bf16 %v745_v58, %v744_v56  ;;  %v3306_v0 = vpop.f32.mrb[20].mxu1  ;;  %v726_v2 = vmul.f32 0.1, %v3282_v63  ;;  %v636_v4 = vpop.f32.mrb[21].mxu0 }
 0x2b0   :  { %v742_v3 = vmul.f32 0.1, %v3306_v0  ;;  %v705_v5 = vpop.f32.mrb[21].mxu1  ;;  %v724_v6 = vmul.f32 0.1, %v636_v4  ;;  %v3283_v8 = vpop.f32.mrb[22].mxu0  ;;  %3324 = vmatprep.mubr.bf16.mxu0 %v769_v61 }
 0x2b1   :  { %v740_v7 = vmul.f32 0.1, %v705_v5  ;;  %v3307_v9 = vpop.f32.mrb[22].mxu1  ;;  %3348 = vmatprep.mubr.bf16.mxu1 %v886_v62  ;;  %v727_v10 = vmul.f32 0.1, %v3283_v8  ;;  %v639_v12 = vpop.f32.mrb[23].mxu0  ;;  %3325 = vmatmul.mubr.bf16.vlgmr.msra.gmra.mrb[24].mxu0 %v770_v59  ;;  %v734_v14 = vmax.f32 %v3282_v63, %v726_v2 }
 0x2b2   :  { %v743_v11 = vmul.f32 0.1, %v3307_v9  ;;  %v708_v13 = vpop.f32.mrb[23].mxu1  ;;  %3349 = vmatmul.mubr.bf16.vlgmr.msra.gmra.mrb[24].mxu1 %v887_v60  ;;  %v725_v15 = vmul.f32 0.1, %v639_v12  ;;  %3357 = vmatpush3.bf16.msra.mxu0 %v3769_v34  ;;  %v750_v17 = vmax.f32 %v3306_v0, %v742_v3  ;;  %v732_v21 = vmax.f32 %v636_v4, %v724_v6 }
 0x2b3   :  { %v741_v16 = vmul.f32 0.1, %v708_v13  ;;  %3381 = vmatpush3.bf16.msra.mxu1 %v3769_v34  ;;  %v735_v18 = vmax.f32 %v3283_v8, %v727_v10  ;;  %3358 = vmatprep.subr.bf16.mxu0 %v3770_v1  ;;  %v748_v22 = vmax.f32 %v705_v5, %v740_v7  ;;  %v3777_v34 = vld [vmem:[#allocation2 + $0x100] sm:$0xff]  }
 0x2b4   :  { %v751_v19 = vmax.f32 %v3307_v9, %v743_v11  ;;  %3382 = vmatprep.subr.bf16.mxu1 %v3770_v1  ;;  %v733_v23 = vmax.f32 %v639_v12, %v725_v15 }
 0x2b5   :  { %v749_v24 = vmax.f32 %v708_v13, %v741_v16  ;;  %v772_v25 = vpack.c.bf16 %v735_v18, %v734_v14 }
 0x2b6   :  { %v889_v26 = vpack.c.bf16 %v751_v19, %v750_v17  ;;  %v771_v27 = vpack.c.bf16 %v733_v23, %v732_v21  ;;  %3359 = vmatpush3.bf16.msra.mxu0 %v3770_v1 }
 0x2b7   :  { %v888_v28 = vpack.c.bf16 %v749_v24, %v748_v22  ;;  %3383 = vmatpush3.bf16.msra.mxu1 %v3770_v1  ;;  %3360 = vmatprep.subr.bf16.mxu0 %v3771_v20  ;;  %v3778_v1 = vld [vmem:[#allocation2 + $0x108] sm:$0xff]  }
 0x2b8   :  { %3384 = vmatprep.subr.bf16.mxu1 %v3771_v20  ;;  %3328 = vmatprep.mubr.bf16.mxu0 %v771_v27 }
 0x2b9   :  { %3352 = vmatprep.mubr.bf16.mxu1 %v888_v28  ;;  %3329 = vmatmul.mubr.bf16.gmra.mrb[28].mxu0 %v772_v25 }
 0x2ba   :  { %3353 = vmatmul.mubr.bf16.gmra.mrb[28].mxu1 %v889_v26  ;;  %3361 = vmatpush3.bf16.msra.mxu0 %v3771_v20 }
 0x2bb   :  { %3385 = vmatpush3.bf16.msra.mxu1 %v3771_v20  ;;  %3362 = vmatprep.subr.bf16.mxu0 %v3772_v29  ;;  %v3779_v20 = vld [vmem:[#allocation2 + $0x110] sm:$0xff]  }
 0x2bc   :  { %3386 = vmatprep.subr.bf16.mxu1 %v3772_v29 }
 0x2be   :  { %3363 = vmatpush3.bf16.msra.mxu0 %v3772_v29 }
 0x2bf   :  { %3387 = vmatpush3.bf16.msra.mxu1 %v3772_v29  ;;  %3364 = vmatprep.subr.bf16.mxu0 %v3773_v30  ;;  %v3780_v29 = vld [vmem:[#allocation2 + $0x118] sm:$0xff]  }
 0x2c0   :  { %3388 = vmatprep.subr.bf16.mxu1 %v3773_v30 }
 0x2c2   :  { %3365 = vmatpush3.bf16.msra.mxu0 %v3773_v30 }
 0x2c3   :  { %3389 = vmatpush3.bf16.msra.mxu1 %v3773_v30  ;;  %3366 = vmatprep.subr.bf16.mxu0 %v3774_v31  ;;  %v3781_v30 = vld [vmem:[#allocation2 + $0x120] sm:$0xff]  }
 0x2c4   :  { %3390 = vmatprep.subr.bf16.mxu1 %v3774_v31 }
 0x2c6   :  { %3367 = vmatpush3.bf16.msra.mxu0 %v3774_v31 }
 0x2c7   :  { %3391 = vmatpush3.bf16.msra.mxu1 %v3774_v31  ;;  %3368 = vmatprep.subr.bf16.mxu0 %v3775_v32  ;;  %v3782_v31 = vld [vmem:[#allocation2 + $0x128] sm:$0xff]  }
 0x2c8   :  { %3392 = vmatprep.subr.bf16.mxu1 %v3775_v32 }
 0x2ca   :  { %3369 = vmatpush3.bf16.msra.mxu0 %v3775_v32 }
 0x2cb   :  { %3393 = vmatpush3.bf16.msra.mxu1 %v3775_v32  ;;  %3370 = vmatprep.subr.bf16.mxu0 %v3776_v33  ;;  %v3783_v32 = vld [vmem:[#allocation2 + $0x130] sm:$0xff]  }
 0x2cc   :  { %3394 = vmatprep.subr.bf16.mxu1 %v3776_v33 }
 0x2ce   :  { %3371 = vmatpush3.bf16.msra.mxu0 %v3776_v33 }
 0x2cf   :  { %3395 = vmatpush3.bf16.msra.mxu1 %v3776_v33  ;;  %3404 = vmatprep.subr.bf16.mxu0 %v3777_v34  ;;  %v3784_v33 = vld [vmem:[#allocation2 + $0x138] sm:$0xff]  }
 0x2d0   :  { %3428 = vmatprep.subr.bf16.mxu1 %v3777_v34 }
 0x384   :  { %v3326_v35 = vpop.f32.mrb[24].mxu0 }
 0x385   :  { %v3350_v36 = vpop.f32.mrb[24].mxu1  ;;  %v957_v37 = vmul.f32 0.1, %v3326_v35  ;;  %v855_v39 = vpop.f32.mrb[25].mxu0 }
 0x386   :  { %v973_v38 = vmul.f32 0.1, %v3350_v36  ;;  %v924_v40 = vpop.f32.mrb[25].mxu1  ;;  %v955_v41 = vmul.f32 0.1, %v855_v39  ;;  %v3327_v43 = vpop.f32.mrb[26].mxu0 }
 0x387   :  { %v971_v42 = vmul.f32 0.1, %v924_v40  ;;  %v3351_v44 = vpop.f32.mrb[26].mxu1  ;;  %v958_v45 = vmul.f32 0.1, %v3327_v43  ;;  %v858_v47 = vpop.f32.mrb[27].mxu0  ;;  %v965_v51 = vmax.f32 %v3326_v35, %v957_v37 }
 0x388   :  { %v974_v46 = vmul.f32 0.1, %v3351_v44  ;;  %v927_v48 = vpop.f32.mrb[27].mxu1  ;;  %v956_v49 = vmul.f32 0.1, %v858_v47  ;;  %v981_v52 = vmax.f32 %v3350_v36, %v973_v38  ;;  %v963_v55 = vmax.f32 %v855_v39, %v955_v41 }
 0x389   :  { %v972_v50 = vmul.f32 0.1, %v927_v48  ;;  %v966_v53 = vmax.f32 %v3327_v43, %v958_v45  ;;  %v979_v56 = vmax.f32 %v924_v40, %v971_v42 }
 0x38a   :  { %v982_v54 = vmax.f32 %v3351_v44, %v974_v46  ;;  %v964_v57 = vmax.f32 %v858_v47, %v956_v49 }
 0x38b   :  { %v980_v58 = vmax.f32 %v927_v48, %v972_v50  ;;  %v1005_v59 = vpack.c.bf16 %v966_v53, %v965_v51 }
 0x38c   :  { %v1122_v60 = vpack.c.bf16 %v982_v54, %v981_v52  ;;  %v1004_v61 = vpack.c.bf16 %v964_v57, %v963_v55  ;;  %v3330_v63 = vpop.f32.mrb[28].mxu0 }
 0x38d   :  { %v1121_v62 = vpack.c.bf16 %v980_v58, %v979_v56  ;;  %v3354_v0 = vpop.f32.mrb[28].mxu1  ;;  %v961_v2 = vmul.f32 0.1, %v3330_v63  ;;  %v871_v4 = vpop.f32.mrb[29].mxu0 }
 0x38e   :  { %v977_v3 = vmul.f32 0.1, %v3354_v0  ;;  %v940_v5 = vpop.f32.mrb[29].mxu1  ;;  %v959_v6 = vmul.f32 0.1, %v871_v4  ;;  %v3331_v8 = vpop.f32.mrb[30].mxu0  ;;  %3372 = vmatprep.mubr.bf16.mxu0 %v1004_v61 }
 0x38f   :  { %v975_v7 = vmul.f32 0.1, %v940_v5  ;;  %v3355_v9 = vpop.f32.mrb[30].mxu1  ;;  %3396 = vmatprep.mubr.bf16.mxu1 %v1121_v62  ;;  %v962_v10 = vmul.f32 0.1, %v3331_v8  ;;  %v874_v12 = vpop.f32.mrb[31].mxu0  ;;  %3373 = vmatmul.mubr.bf16.vlgmr.msra.gmra.mrb[32].mxu0 %v1005_v59  ;;  %v969_v14 = vmax.f32 %v3330_v63, %v961_v2 }
 0x390   :  { %v978_v11 = vmul.f32 0.1, %v3355_v9  ;;  %v943_v13 = vpop.f32.mrb[31].mxu1  ;;  %3397 = vmatmul.mubr.bf16.vlgmr.msra.gmra.mrb[32].mxu1 %v1122_v60  ;;  %v960_v15 = vmul.f32 0.1, %v874_v12  ;;  %3405 = vmatpush3.bf16.msra.mxu0 %v3777_v34  ;;  %v985_v17 = vmax.f32 %v3354_v0, %v977_v3  ;;  %v967_v21 = vmax.f32 %v871_v4, %v959_v6 }
 0x391   :  { %v976_v16 = vmul.f32 0.1, %v943_v13  ;;  %3429 = vmatpush3.bf16.msra.mxu1 %v3777_v34  ;;  %v970_v18 = vmax.f32 %v3331_v8, %v962_v10  ;;  %3406 = vmatprep.subr.bf16.mxu0 %v3778_v1  ;;  %v983_v22 = vmax.f32 %v940_v5, %v975_v7  ;;  %v3785_v34 = vld [vmem:[#allocation2 + $0x140] sm:$0xff]  }
 0x392   :  { %v986_v19 = vmax.f32 %v3355_v9, %v978_v11  ;;  %3430 = vmatprep.subr.bf16.mxu1 %v3778_v1  ;;  %v968_v23 = vmax.f32 %v874_v12, %v960_v15 }
 0x393   :  { %v984_v24 = vmax.f32 %v943_v13, %v976_v16  ;;  %v1007_v25 = vpack.c.bf16 %v970_v18, %v969_v14 }
 0x394   :  { %v1124_v26 = vpack.c.bf16 %v986_v19, %v985_v17  ;;  %v1006_v27 = vpack.c.bf16 %v968_v23, %v967_v21  ;;  %3407 = vmatpush3.bf16.msra.mxu0 %v3778_v1 }
 0x395   :  { %v1123_v28 = vpack.c.bf16 %v984_v24, %v983_v22  ;;  %3431 = vmatpush3.bf16.msra.mxu1 %v3778_v1  ;;  %3408 = vmatprep.subr.bf16.mxu0 %v3779_v20  ;;  %v3786_v1 = vld [vmem:[#allocation2 + $0x148] sm:$0xff]  }
 0x396   :  { %3432 = vmatprep.subr.bf16.mxu1 %v3779_v20  ;;  %3376 = vmatprep.mubr.bf16.mxu0 %v1006_v27 }
 0x397   :  { %3400 = vmatprep.mubr.bf16.mxu1 %v1123_v28  ;;  %3377 = vmatmul.mubr.bf16.gmra.mrb[36].mxu0 %v1007_v25 }
 0x398   :  { %3401 = vmatmul.mubr.bf16.gmra.mrb[36].mxu1 %v1124_v26  ;;  %3409 = vmatpush3.bf16.msra.mxu0 %v3779_v20 }
 0x399   :  { %3433 = vmatpush3.bf16.msra.mxu1 %v3779_v20  ;;  %3410 = vmatprep.subr.bf16.mxu0 %v3780_v29  ;;  %v3787_v20 = vld [vmem:[#allocation2 + $0x150] sm:$0xff]  }
 0x39a   :  { %3434 = vmatprep.subr.bf16.mxu1 %v3780_v29 }
 0x39c   :  { %3411 = vmatpush3.bf16.msra.mxu0 %v3780_v29 }
 0x39d   :  { %3435 = vmatpush3.bf16.msra.mxu1 %v3780_v29  ;;  %3412 = vmatprep.subr.bf16.mxu0 %v3781_v30  ;;  %v3788_v29 = vld [vmem:[#allocation2 + $0x158] sm:$0xff]  }
 0x39e   :  { %3436 = vmatprep.subr.bf16.mxu1 %v3781_v30 }
 0x3a0   :  { %3413 = vmatpush3.bf16.msra.mxu0 %v3781_v30 }
 0x3a1   :  { %3437 = vmatpush3.bf16.msra.mxu1 %v3781_v30  ;;  %3414 = vmatprep.subr.bf16.mxu0 %v3782_v31  ;;  %v3789_v30 = vld [vmem:[#allocation2 + $0x160] sm:$0xff]  }
 0x3a2   :  { %3438 = vmatprep.subr.bf16.mxu1 %v3782_v31 }
 0x3a4   :  { %3415 = vmatpush3.bf16.msra.mxu0 %v3782_v31 }
 0x3a5   :  { %3439 = vmatpush3.bf16.msra.mxu1 %v3782_v31  ;;  %3416 = vmatprep.subr.bf16.mxu0 %v3783_v32  ;;  %v3790_v31 = vld [vmem:[#allocation2 + $0x168] sm:$0xff]  }
 0x3a6   :  { %3440 = vmatprep.subr.bf16.mxu1 %v3783_v32 }
 0x3a8   :  { %3417 = vmatpush3.bf16.msra.mxu0 %v3783_v32 }
 0x3a9   :  { %3441 = vmatpush3.bf16.msra.mxu1 %v3783_v32  ;;  %3418 = vmatprep.subr.bf16.mxu0 %v3784_v33  ;;  %v3791_v32 = vld [vmem:[#allocation2 + $0x170] sm:$0xff]  }
 0x3aa   :  { %3442 = vmatprep.subr.bf16.mxu1 %v3784_v33 }
 0x3ac   :  { %3419 = vmatpush3.bf16.msra.mxu0 %v3784_v33 }
 0x3ad   :  { %3443 = vmatpush3.bf16.msra.mxu1 %v3784_v33  ;;  %3452 = vmatprep.subr.bf16.mxu0 %v3785_v34  ;;  %v3792_v33 = vld [vmem:[#allocation2 + $0x178] sm:$0xff]  }
 0x3ae   :  { %3476 = vmatprep.subr.bf16.mxu1 %v3785_v34 }
 0x462   :  { %v3374_v35 = vpop.f32.mrb[32].mxu0 }
 0x463   :  { %v3398_v36 = vpop.f32.mrb[32].mxu1  ;;  %v1192_v37 = vmul.f32 0.1, %v3374_v35  ;;  %v1090_v39 = vpop.f32.mrb[33].mxu0 }
 0x464   :  { %v1208_v38 = vmul.f32 0.1, %v3398_v36  ;;  %v1159_v40 = vpop.f32.mrb[33].mxu1  ;;  %v1190_v41 = vmul.f32 0.1, %v1090_v39  ;;  %v3375_v43 = vpop.f32.mrb[34].mxu0 }
 0x465   :  { %v1206_v42 = vmul.f32 0.1, %v1159_v40  ;;  %v3399_v44 = vpop.f32.mrb[34].mxu1  ;;  %v1193_v45 = vmul.f32 0.1, %v3375_v43  ;;  %v1093_v47 = vpop.f32.mrb[35].mxu0  ;;  %v1200_v51 = vmax.f32 %v3374_v35, %v1192_v37 }
 0x466   :  { %v1209_v46 = vmul.f32 0.1, %v3399_v44  ;;  %v1162_v48 = vpop.f32.mrb[35].mxu1  ;;  %v1191_v49 = vmul.f32 0.1, %v1093_v47  ;;  %v1216_v52 = vmax.f32 %v3398_v36, %v1208_v38  ;;  %v1198_v55 = vmax.f32 %v1090_v39, %v1190_v41 }
 0x467   :  { %v1207_v50 = vmul.f32 0.1, %v1162_v48  ;;  %v1201_v53 = vmax.f32 %v3375_v43, %v1193_v45  ;;  %v1214_v56 = vmax.f32 %v1159_v40, %v1206_v42 }
 0x468   :  { %v1217_v54 = vmax.f32 %v3399_v44, %v1209_v46  ;;  %v1199_v57 = vmax.f32 %v1093_v47, %v1191_v49 }
 0x469   :  { %v1215_v58 = vmax.f32 %v1162_v48, %v1207_v50  ;;  %v1240_v59 = vpack.c.bf16 %v1201_v53, %v1200_v51 }
 0x46a   :  { %v1357_v60 = vpack.c.bf16 %v1217_v54, %v1216_v52  ;;  %v1239_v61 = vpack.c.bf16 %v1199_v57, %v1198_v55  ;;  %v3378_v63 = vpop.f32.mrb[36].mxu0 }
 0x46b   :  { %v1356_v62 = vpack.c.bf16 %v1215_v58, %v1214_v56  ;;  %v3402_v0 = vpop.f32.mrb[36].mxu1  ;;  %v1196_v2 = vmul.f32 0.1, %v3378_v63  ;;  %v1106_v4 = vpop.f32.mrb[37].mxu0 }
 0x46c   :  { %v1212_v3 = vmul.f32 0.1, %v3402_v0  ;;  %v1175_v5 = vpop.f32.mrb[37].mxu1  ;;  %v1194_v6 = vmul.f32 0.1, %v1106_v4  ;;  %v3379_v8 = vpop.f32.mrb[38].mxu0  ;;  %3420 = vmatprep.mubr.bf16.mxu0 %v1239_v61 }
 0x46d   :  { %v1210_v7 = vmul.f32 0.1, %v1175_v5  ;;  %v3403_v9 = vpop.f32.mrb[38].mxu1  ;;  %3444 = vmatprep.mubr.bf16.mxu1 %v1356_v62  ;;  %v1197_v10 = vmul.f32 0.1, %v3379_v8  ;;  %v1109_v12 = vpop.f32.mrb[39].mxu0  ;;  %3421 = vmatmul.mubr.bf16.vlgmr.msra.gmra.mrb[40].mxu0 %v1240_v59  ;;  %v1204_v14 = vmax.f32 %v3378_v63, %v1196_v2 }
 0x46e   :  { %v1213_v11 = vmul.f32 0.1, %v3403_v9  ;;  %v1178_v13 = vpop.f32.mrb[39].mxu1  ;;  %3445 = vmatmul.mubr.bf16.vlgmr.msra.gmra.mrb[40].mxu1 %v1357_v60  ;;  %v1195_v15 = vmul.f32 0.1, %v1109_v12  ;;  %3453 = vmatpush3.bf16.msra.mxu0 %v3785_v34  ;;  %v1220_v17 = vmax.f32 %v3402_v0, %v1212_v3  ;;  %v1202_v21 = vmax.f32 %v1106_v4, %v1194_v6 }
 0x46f   :  { %v1211_v16 = vmul.f32 0.1, %v1178_v13  ;;  %3477 = vmatpush3.bf16.msra.mxu1 %v3785_v34  ;;  %v1205_v18 = vmax.f32 %v3379_v8, %v1197_v10  ;;  %3454 = vmatprep.subr.bf16.mxu0 %v3786_v1  ;;  %v1218_v22 = vmax.f32 %v1175_v5, %v1210_v7  ;;  %v3793_v34 = vld [vmem:[#allocation2 + $0x180] sm:$0xff]  }
 0x470   :  { %v1221_v19 = vmax.f32 %v3403_v9, %v1213_v11  ;;  %3478 = vmatprep.subr.bf16.mxu1 %v3786_v1  ;;  %v1203_v23 = vmax.f32 %v1109_v12, %v1195_v15 }
 0x471   :  { %v1219_v24 = vmax.f32 %v1178_v13, %v1211_v16  ;;  %v1242_v25 = vpack.c.bf16 %v1205_v18, %v1204_v14 }
 0x472   :  { %v1359_v26 = vpack.c.bf16 %v1221_v19, %v1220_v17  ;;  %v1241_v27 = vpack.c.bf16 %v1203_v23, %v1202_v21  ;;  %3455 = vmatpush3.bf16.msra.mxu0 %v3786_v1 }
 0x473   :  { %v1358_v28 = vpack.c.bf16 %v1219_v24, %v1218_v22  ;;  %3479 = vmatpush3.bf16.msra.mxu1 %v3786_v1  ;;  %3456 = vmatprep.subr.bf16.mxu0 %v3787_v20  ;;  %v3794_v1 = vld [vmem:[#allocation2 + $0x188] sm:$0xff]  }
 0x474   :  { %3480 = vmatprep.subr.bf16.mxu1 %v3787_v20  ;;  %3424 = vmatprep.mubr.bf16.mxu0 %v1241_v27 }
 0x475   :  { %3448 = vmatprep.mubr.bf16.mxu1 %v1358_v28  ;;  %3425 = vmatmul.mubr.bf16.gmra.mrb[44].mxu0 %v1242_v25 }
 0x476   :  { %3449 = vmatmul.mubr.bf16.gmra.mrb[44].mxu1 %v1359_v26  ;;  %3457 = vmatpush3.bf16.msra.mxu0 %v3787_v20 }
 0x477   :  { %3481 = vmatpush3.bf16.msra.mxu1 %v3787_v20  ;;  %3458 = vmatprep.subr.bf16.mxu0 %v3788_v29  ;;  %v3795_v20 = vld [vmem:[#allocation2 + $0x190] sm:$0xff]  }
 0x478   :  { %3482 = vmatprep.subr.bf16.mxu1 %v3788_v29 }
 0x47a   :  { %3459 = vmatpush3.bf16.msra.mxu0 %v3788_v29 }
 0x47b   :  { %3483 = vmatpush3.bf16.msra.mxu1 %v3788_v29  ;;  %3460 = vmatprep.subr.bf16.mxu0 %v3789_v30  ;;  %v3796_v29 = vld [vmem:[#allocation2 + $0x198] sm:$0xff]  }
 0x47c   :  { %3484 = vmatprep.subr.bf16.mxu1 %v3789_v30 }
 0x47e   :  { %3461 = vmatpush3.bf16.msra.mxu0 %v3789_v30 }
 0x47f   :  { %3485 = vmatpush3.bf16.msra.mxu1 %v3789_v30  ;;  %3462 = vmatprep.subr.bf16.mxu0 %v3790_v31  ;;  %v3797_v30 = vld [vmem:[#allocation2 + $0x1a0] sm:$0xff]  }
 0x480   :  { %3486 = vmatprep.subr.bf16.mxu1 %v3790_v31 }
 0x482   :  { %3463 = vmatpush3.bf16.msra.mxu0 %v3790_v31 }
 0x483   :  { %3487 = vmatpush3.bf16.msra.mxu1 %v3790_v31  ;;  %3464 = vmatprep.subr.bf16.mxu0 %v3791_v32  ;;  %v3798_v31 = vld [vmem:[#allocation2 + $0x1a8] sm:$0xff]  }
 0x484   :  { %3488 = vmatprep.subr.bf16.mxu1 %v3791_v32 }
 0x486   :  { %3465 = vmatpush3.bf16.msra.mxu0 %v3791_v32 }
 0x487   :  { %3489 = vmatpush3.bf16.msra.mxu1 %v3791_v32  ;;  %3466 = vmatprep.subr.bf16.mxu0 %v3792_v33  ;;  %v3799_v32 = vld [vmem:[#allocation2 + $0x1b0] sm:$0xff]  }
 0x488   :  { %3490 = vmatprep.subr.bf16.mxu1 %v3792_v33 }
 0x48a   :  { %3467 = vmatpush3.bf16.msra.mxu0 %v3792_v33 }
 0x48b   :  { %3491 = vmatpush3.bf16.msra.mxu1 %v3792_v33  ;;  %3500 = vmatprep.subr.bf16.mxu0 %v3793_v34  ;;  %v3800_v33 = vld [vmem:[#allocation2 + $0x1b8] sm:$0xff]  }
 0x48c   :  { %3524 = vmatprep.subr.bf16.mxu1 %v3793_v34 }
 0x540   :  { %v3422_v35 = vpop.f32.mrb[40].mxu0 }
 0x541   :  { %v3446_v36 = vpop.f32.mrb[40].mxu1  ;;  %v1427_v37 = vmul.f32 0.1, %v3422_v35  ;;  %v1325_v39 = vpop.f32.mrb[41].mxu0 }
 0x542   :  { %v1443_v38 = vmul.f32 0.1, %v3446_v36  ;;  %v1394_v40 = vpop.f32.mrb[41].mxu1  ;;  %v1425_v41 = vmul.f32 0.1, %v1325_v39  ;;  %v3423_v43 = vpop.f32.mrb[42].mxu0 }
 0x543   :  { %v1441_v42 = vmul.f32 0.1, %v1394_v40  ;;  %v3447_v44 = vpop.f32.mrb[42].mxu1  ;;  %v1428_v45 = vmul.f32 0.1, %v3423_v43  ;;  %v1328_v47 = vpop.f32.mrb[43].mxu0  ;;  %v1435_v51 = vmax.f32 %v3422_v35, %v1427_v37 }
 0x544   :  { %v1444_v46 = vmul.f32 0.1, %v3447_v44  ;;  %v1397_v48 = vpop.f32.mrb[43].mxu1  ;;  %v1426_v49 = vmul.f32 0.1, %v1328_v47  ;;  %v1451_v52 = vmax.f32 %v3446_v36, %v1443_v38  ;;  %v1433_v55 = vmax.f32 %v1325_v39, %v1425_v41 }
 0x545   :  { %v1442_v50 = vmul.f32 0.1, %v1397_v48  ;;  %v1436_v53 = vmax.f32 %v3423_v43, %v1428_v45  ;;  %v1449_v56 = vmax.f32 %v1394_v40, %v1441_v42 }
 0x546   :  { %v1452_v54 = vmax.f32 %v3447_v44, %v1444_v46  ;;  %v1434_v57 = vmax.f32 %v1328_v47, %v1426_v49 }
 0x547   :  { %v1450_v58 = vmax.f32 %v1397_v48, %v1442_v50  ;;  %v1475_v59 = vpack.c.bf16 %v1436_v53, %v1435_v51 }
 0x548   :  { %v1592_v60 = vpack.c.bf16 %v1452_v54, %v1451_v52  ;;  %v1474_v61 = vpack.c.bf16 %v1434_v57, %v1433_v55  ;;  %v3426_v63 = vpop.f32.mrb[44].mxu0 }
 0x549   :  { %v1591_v62 = vpack.c.bf16 %v1450_v58, %v1449_v56  ;;  %v3450_v0 = vpop.f32.mrb[44].mxu1  ;;  %v1431_v2 = vmul.f32 0.1, %v3426_v63  ;;  %v1341_v4 = vpop.f32.mrb[45].mxu0 }
 0x54a   :  { %v1447_v3 = vmul.f32 0.1, %v3450_v0  ;;  %v1410_v5 = vpop.f32.mrb[45].mxu1  ;;  %v1429_v6 = vmul.f32 0.1, %v1341_v4  ;;  %v3427_v8 = vpop.f32.mrb[46].mxu0  ;;  %3468 = vmatprep.mubr.bf16.mxu0 %v1474_v61 }
 0x54b   :  { %v1445_v7 = vmul.f32 0.1, %v1410_v5  ;;  %v3451_v9 = vpop.f32.mrb[46].mxu1  ;;  %3492 = vmatprep.mubr.bf16.mxu1 %v1591_v62  ;;  %v1432_v10 = vmul.f32 0.1, %v3427_v8  ;;  %v1344_v12 = vpop.f32.mrb[47].mxu0  ;;  %3469 = vmatmul.mubr.bf16.vlgmr.msra.gmra.mrb[48].mxu0 %v1475_v59  ;;  %v1439_v14 = vmax.f32 %v3426_v63, %v1431_v2 }
 0x54c   :  { %v1448_v11 = vmul.f32 0.1, %v3451_v9  ;;  %v1413_v13 = vpop.f32.mrb[47].mxu1  ;;  %3493 = vmatmul.mubr.bf16.vlgmr.msra.gmra.mrb[48].mxu1 %v1592_v60  ;;  %v1430_v15 = vmul.f32 0.1, %v1344_v12  ;;  %3501 = vmatpush3.bf16.msra.mxu0 %v3793_v34  ;;  %v1455_v17 = vmax.f32 %v3450_v0, %v1447_v3  ;;  %v1437_v21 = vmax.f32 %v1341_v4, %v1429_v6 }
 0x54d   :  { %v1446_v16 = vmul.f32 0.1, %v1413_v13  ;;  %3525 = vmatpush3.bf16.msra.mxu1 %v3793_v34  ;;  %v1440_v18 = vmax.f32 %v3427_v8, %v1432_v10  ;;  %3502 = vmatprep.subr.bf16.mxu0 %v3794_v1  ;;  %v1453_v22 = vmax.f32 %v1410_v5, %v1445_v7  ;;  %v3801_v34 = vld [vmem:[#allocation2 + $0x1c0] sm:$0xff]  }
 0x54e   :  { %v1456_v19 = vmax.f32 %v3451_v9, %v1448_v11  ;;  %3526 = vmatprep.subr.bf16.mxu1 %v3794_v1  ;;  %v1438_v23 = vmax.f32 %v1344_v12, %v1430_v15 }
 0x54f   :  { %v1454_v24 = vmax.f32 %v1413_v13, %v1446_v16  ;;  %v1477_v25 = vpack.c.bf16 %v1440_v18, %v1439_v14 }
 0x550   :  { %v1594_v26 = vpack.c.bf16 %v1456_v19, %v1455_v17  ;;  %v1476_v27 = vpack.c.bf16 %v1438_v23, %v1437_v21  ;;  %3503 = vmatpush3.bf16.msra.mxu0 %v3794_v1 }
 0x551   :  { %v1593_v28 = vpack.c.bf16 %v1454_v24, %v1453_v22  ;;  %3527 = vmatpush3.bf16.msra.mxu1 %v3794_v1  ;;  %3504 = vmatprep.subr.bf16.mxu0 %v3795_v20  ;;  %v3802_v1 = vld [vmem:[#allocation2 + $0x1c8] sm:$0xff]  }
 0x552   :  { %3528 = vmatprep.subr.bf16.mxu1 %v3795_v20  ;;  %3472 = vmatprep.mubr.bf16.mxu0 %v1476_v27 }
 0x553   :  { %3496 = vmatprep.mubr.bf16.mxu1 %v1593_v28  ;;  %3473 = vmatmul.mubr.bf16.gmra.mrb[52].mxu0 %v1477_v25 }
 0x554   :  { %3497 = vmatmul.mubr.bf16.gmra.mrb[52].mxu1 %v1594_v26  ;;  %3505 = vmatpush3.bf16.msra.mxu0 %v3795_v20 }
 0x555   :  { %3529 = vmatpush3.bf16.msra.mxu1 %v3795_v20  ;;  %3506 = vmatprep.subr.bf16.mxu0 %v3796_v29  ;;  %v3803_v20 = vld [vmem:[#allocation2 + $0x1d0] sm:$0xff]  }
 0x556   :  { %3530 = vmatprep.subr.bf16.mxu1 %v3796_v29 }
 0x558   :  { %3507 = vmatpush3.bf16.msra.mxu0 %v3796_v29 }
 0x559   :  { %3531 = vmatpush3.bf16.msra.mxu1 %v3796_v29  ;;  %3508 = vmatprep.subr.bf16.mxu0 %v3797_v30  ;;  %v3804_v29 = vld [vmem:[#allocation2 + $0x1d8] sm:$0xff]  }
 0x55a   :  { %3532 = vmatprep.subr.bf16.mxu1 %v3797_v30 }
 0x55c   :  { %3509 = vmatpush3.bf16.msra.mxu0 %v3797_v30 }
 0x55d   :  { %3533 = vmatpush3.bf16.msra.mxu1 %v3797_v30  ;;  %3510 = vmatprep.subr.bf16.mxu0 %v3798_v31  ;;  %v3805_v30 = vld [vmem:[#allocation2 + $0x1e0] sm:$0xff]  }
 0x55e   :  { %3534 = vmatprep.subr.bf16.mxu1 %v3798_v31 }
 0x560   :  { %3511 = vmatpush3.bf16.msra.mxu0 %v3798_v31 }
 0x561   :  { %3535 = vmatpush3.bf16.msra.mxu1 %v3798_v31  ;;  %3512 = vmatprep.subr.bf16.mxu0 %v3799_v32  ;;  %v3806_v31 = vld [vmem:[#allocation2 + $0x1e8] sm:$0xff]  }
 0x562   :  { %3536 = vmatprep.subr.bf16.mxu1 %v3799_v32 }
 0x564   :  { %3513 = vmatpush3.bf16.msra.mxu0 %v3799_v32 }
 0x565   :  { %3537 = vmatpush3.bf16.msra.mxu1 %v3799_v32  ;;  %3514 = vmatprep.subr.bf16.mxu0 %v3800_v33  ;;  %v3807_v32 = vld [vmem:[#allocation2 + $0x1f0] sm:$0xff]  }
 0x566   :  { %3538 = vmatprep.subr.bf16.mxu1 %v3800_v33 }
 0x568   :  { %3515 = vmatpush3.bf16.msra.mxu0 %v3800_v33 }
 0x569   :  { %3539 = vmatpush3.bf16.msra.mxu1 %v3800_v33  ;;  %3548 = vmatprep.subr.bf16.mxu0 %v3801_v34  ;;  %v3808_v33 = vld [vmem:[#allocation2 + $0x1f8] sm:$0xff]  }
 0x56a   :  { %3572 = vmatprep.subr.bf16.mxu1 %v3801_v34 }
 0x61e   :  { %v3470_v35 = vpop.f32.mrb[48].mxu0 }
 0x61f   :  { %v3494_v36 = vpop.f32.mrb[48].mxu1  ;;  %v1662_v37 = vmul.f32 0.1, %v3470_v35  ;;  %v1560_v39 = vpop.f32.mrb[49].mxu0 }
 0x620   :  { %v1678_v38 = vmul.f32 0.1, %v3494_v36  ;;  %v1629_v40 = vpop.f32.mrb[49].mxu1  ;;  %v1660_v41 = vmul.f32 0.1, %v1560_v39  ;;  %v3471_v43 = vpop.f32.mrb[50].mxu0 }
 0x621   :  { %v1676_v42 = vmul.f32 0.1, %v1629_v40  ;;  %v3495_v44 = vpop.f32.mrb[50].mxu1  ;;  %v1663_v45 = vmul.f32 0.1, %v3471_v43  ;;  %v1563_v47 = vpop.f32.mrb[51].mxu0  ;;  %v1670_v51 = vmax.f32 %v3470_v35, %v1662_v37 }
 0x622   :  { %v1679_v46 = vmul.f32 0.1, %v3495_v44  ;;  %v1632_v48 = vpop.f32.mrb[51].mxu1  ;;  %v1661_v49 = vmul.f32 0.1, %v1563_v47  ;;  %v1686_v52 = vmax.f32 %v3494_v36, %v1678_v38  ;;  %v1668_v55 = vmax.f32 %v1560_v39, %v1660_v41 }
 0x623   :  { %v1677_v50 = vmul.f32 0.1, %v1632_v48  ;;  %v1671_v53 = vmax.f32 %v3471_v43, %v1663_v45  ;;  %v1684_v56 = vmax.f32 %v1629_v40, %v1676_v42 }
 0x624   :  { %v1687_v54 = vmax.f32 %v3495_v44, %v1679_v46  ;;  %v1669_v57 = vmax.f32 %v1563_v47, %v1661_v49 }
 0x625   :  { %v1685_v58 = vmax.f32 %v1632_v48, %v1677_v50  ;;  %v1710_v59 = vpack.c.bf16 %v1671_v53, %v1670_v51 }
 0x626   :  { %v1827_v60 = vpack.c.bf16 %v1687_v54, %v1686_v52  ;;  %v1709_v61 = vpack.c.bf16 %v1669_v57, %v1668_v55  ;;  %v3474_v63 = vpop.f32.mrb[52].mxu0 }
 0x627   :  { %v1826_v62 = vpack.c.bf16 %v1685_v58, %v1684_v56  ;;  %v3498_v0 = vpop.f32.mrb[52].mxu1  ;;  %v1666_v2 = vmul.f32 0.1, %v3474_v63  ;;  %v1576_v4 = vpop.f32.mrb[53].mxu0 }
 0x628   :  { %v1682_v3 = vmul.f32 0.1, %v3498_v0  ;;  %v1645_v5 = vpop.f32.mrb[53].mxu1  ;;  %v1664_v6 = vmul.f32 0.1, %v1576_v4  ;;  %v3475_v8 = vpop.f32.mrb[54].mxu0  ;;  %3516 = vmatprep.mubr.bf16.mxu0 %v1709_v61 }
 0x629   :  { %v1680_v7 = vmul.f32 0.1, %v1645_v5  ;;  %v3499_v9 = vpop.f32.mrb[54].mxu1  ;;  %3540 = vmatprep.mubr.bf16.mxu1 %v1826_v62  ;;  %v1667_v10 = vmul.f32 0.1, %v3475_v8  ;;  %v1579_v12 = vpop.f32.mrb[55].mxu0  ;;  %3517 = vmatmul.mubr.bf16.vlgmr.msra.gmra.mrb[56].mxu0 %v1710_v59  ;;  %v1674_v14 = vmax.f32 %v3474_v63, %v1666_v2 }
 0x62a   :  { %v1683_v11 = vmul.f32 0.1, %v3499_v9  ;;  %v1648_v13 = vpop.f32.mrb[55].mxu1  ;;  %3541 = vmatmul.mubr.bf16.vlgmr.msra.gmra.mrb[56].mxu1 %v1827_v60  ;;  %v1665_v15 = vmul.f32 0.1, %v1579_v12  ;;  %3549 = vmatpush3.bf16.msra.mxu0 %v3801_v34  ;;  %v1690_v17 = vmax.f32 %v3498_v0, %v1682_v3  ;;  %v1672_v21 = vmax.f32 %v1576_v4, %v1664_v6 }
 0x62b   :  { %v1681_v16 = vmul.f32 0.1, %v1648_v13  ;;  %3573 = vmatpush3.bf16.msra.mxu1 %v3801_v34  ;;  %v1675_v18 = vmax.f32 %v3475_v8, %v1667_v10  ;;  %3550 = vmatprep.subr.bf16.mxu0 %v3802_v1  ;;  %v1688_v22 = vmax.f32 %v1645_v5, %v1680_v7  ;;  %v3809_v34 = vld [vmem:[#allocation2 + $0x200] sm:$0xff]  }
 0x62c   :  { %v1691_v19 = vmax.f32 %v3499_v9, %v1683_v11  ;;  %3574 = vmatprep.subr.bf16.mxu1 %v3802_v1  ;;  %v1673_v23 = vmax.f32 %v1579_v12, %v1665_v15 }
 0x62d   :  { %v1689_v24 = vmax.f32 %v1648_v13, %v1681_v16  ;;  %v1712_v25 = vpack.c.bf16 %v1675_v18, %v1674_v14 }
 0x62e   :  { %v1829_v26 = vpack.c.bf16 %v1691_v19, %v1690_v17  ;;  %v1711_v27 = vpack.c.bf16 %v1673_v23, %v1672_v21  ;;  %3551 = vmatpush3.bf16.msra.mxu0 %v3802_v1 }
 0x62f   :  { %v1828_v28 = vpack.c.bf16 %v1689_v24, %v1688_v22  ;;  %3575 = vmatpush3.bf16.msra.mxu1 %v3802_v1  ;;  %3552 = vmatprep.subr.bf16.mxu0 %v3803_v20  ;;  %v3810_v1 = vld [vmem:[#allocation2 + $0x208] sm:$0xff]  }
 0x630   :  { %3576 = vmatprep.subr.bf16.mxu1 %v3803_v20  ;;  %3520 = vmatprep.mubr.bf16.mxu0 %v1711_v27 }
 0x631   :  { %3544 = vmatprep.mubr.bf16.mxu1 %v1828_v28  ;;  %3521 = vmatmul.mubr.bf16.gmra.mrb[60].mxu0 %v1712_v25 }
 0x632   :  { %3545 = vmatmul.mubr.bf16.gmra.mrb[60].mxu1 %v1829_v26  ;;  %3553 = vmatpush3.bf16.msra.mxu0 %v3803_v20 }
 0x633   :  { %3577 = vmatpush3.bf16.msra.mxu1 %v3803_v20  ;;  %3554 = vmatprep.subr.bf16.mxu0 %v3804_v29  ;;  %v3811_v20 = vld [vmem:[#allocation2 + $0x210] sm:$0xff]  }
 0x634   :  { %3578 = vmatprep.subr.bf16.mxu1 %v3804_v29 }
 0x636   :  { %3555 = vmatpush3.bf16.msra.mxu0 %v3804_v29 }
 0x637   :  { %3579 = vmatpush3.bf16.msra.mxu1 %v3804_v29  ;;  %3556 = vmatprep.subr.bf16.mxu0 %v3805_v30  ;;  %v3812_v29 = vld [vmem:[#allocation2 + $0x218] sm:$0xff]  }
 0x638   :  { %3580 = vmatprep.subr.bf16.mxu1 %v3805_v30 }
 0x63a   :  { %3557 = vmatpush3.bf16.msra.mxu0 %v3805_v30 }
 0x63b   :  { %3581 = vmatpush3.bf16.msra.mxu1 %v3805_v30  ;;  %3558 = vmatprep.subr.bf16.mxu0 %v3806_v31  ;;  %v3813_v30 = vld [vmem:[#allocation2 + $0x220] sm:$0xff]  }
 0x63c   :  { %3582 = vmatprep.subr.bf16.mxu1 %v3806_v31 }
 0x63e   :  { %3559 = vmatpush3.bf16.msra.mxu0 %v3806_v31 }
 0x63f   :  { %3583 = vmatpush3.bf16.msra.mxu1 %v3806_v31  ;;  %3560 = vmatprep.subr.bf16.mxu0 %v3807_v32  ;;  %v3814_v31 = vld [vmem:[#allocation2 + $0x228] sm:$0xff]  }
 0x640   :  { %3584 = vmatprep.subr.bf16.mxu1 %v3807_v32 }
 0x642   :  { %3561 = vmatpush3.bf16.msra.mxu0 %v3807_v32 }
 0x643   :  { %3585 = vmatpush3.bf16.msra.mxu1 %v3807_v32  ;;  %3562 = vmatprep.subr.bf16.mxu0 %v3808_v33  ;;  %v3815_v32 = vld [vmem:[#allocation2 + $0x230] sm:$0xff]  }
 0x644   :  { %3586 = vmatprep.subr.bf16.mxu1 %v3808_v33 }
 0x646   :  { %3563 = vmatpush3.bf16.msra.mxu0 %v3808_v33 }
 0x647   :  { %3587 = vmatpush3.bf16.msra.mxu1 %v3808_v33  ;;  %3596 = vmatprep.subr.bf16.mxu0 %v3809_v34  ;;  %v3816_v33 = vld [vmem:[#allocation2 + $0x238] sm:$0xff]  }
 0x648   :  { %3620 = vmatprep.subr.bf16.mxu1 %v3809_v34 }
 0x6fc   :  { %v3518_v35 = vpop.f32.mrb[56].mxu0 }
 0x6fd   :  { %v3542_v36 = vpop.f32.mrb[56].mxu1  ;;  %v1897_v37 = vmul.f32 0.1, %v3518_v35  ;;  %v1795_v39 = vpop.f32.mrb[57].mxu0 }
 0x6fe   :  { %v1913_v38 = vmul.f32 0.1, %v3542_v36  ;;  %v1864_v40 = vpop.f32.mrb[57].mxu1  ;;  %v1895_v41 = vmul.f32 0.1, %v1795_v39  ;;  %v3519_v43 = vpop.f32.mrb[58].mxu0 }
 0x6ff   :  { %v1911_v42 = vmul.f32 0.1, %v1864_v40  ;;  %v3543_v44 = vpop.f32.mrb[58].mxu1  ;;  %v1898_v45 = vmul.f32 0.1, %v3519_v43  ;;  %v1798_v47 = vpop.f32.mrb[59].mxu0  ;;  %v1905_v51 = vmax.f32 %v3518_v35, %v1897_v37 }
 0x700   :  { %v1914_v46 = vmul.f32 0.1, %v3543_v44  ;;  %v1867_v48 = vpop.f32.mrb[59].mxu1  ;;  %v1896_v49 = vmul.f32 0.1, %v1798_v47  ;;  %v1921_v52 = vmax.f32 %v3542_v36, %v1913_v38  ;;  %v1903_v55 = vmax.f32 %v1795_v39, %v1895_v41 }
 0x701   :  { %v1912_v50 = vmul.f32 0.1, %v1867_v48  ;;  %v1906_v53 = vmax.f32 %v3519_v43, %v1898_v45  ;;  %v1919_v56 = vmax.f32 %v1864_v40, %v1911_v42 }
 0x702   :  { %v1922_v54 = vmax.f32 %v3543_v44, %v1914_v46  ;;  %v1904_v57 = vmax.f32 %v1798_v47, %v1896_v49 }
 0x703   :  { %v1920_v58 = vmax.f32 %v1867_v48, %v1912_v50  ;;  %v1945_v59 = vpack.c.bf16 %v1906_v53, %v1905_v51 }
 0x704   :  { %v2062_v60 = vpack.c.bf16 %v1922_v54, %v1921_v52  ;;  %v1944_v61 = vpack.c.bf16 %v1904_v57, %v1903_v55  ;;  %v3522_v63 = vpop.f32.mrb[60].mxu0 }
 0x705   :  { %v2061_v62 = vpack.c.bf16 %v1920_v58, %v1919_v56  ;;  %v3546_v0 = vpop.f32.mrb[60].mxu1  ;;  %v1901_v2 = vmul.f32 0.1, %v3522_v63  ;;  %v1811_v4 = vpop.f32.mrb[61].mxu0 }
 0x706   :  { %v1917_v3 = vmul.f32 0.1, %v3546_v0  ;;  %v1880_v5 = vpop.f32.mrb[61].mxu1  ;;  %v1899_v6 = vmul.f32 0.1, %v1811_v4  ;;  %v3523_v8 = vpop.f32.mrb[62].mxu0  ;;  %3564 = vmatprep.mubr.bf16.mxu0 %v1944_v61 }
 0x707   :  { %v1915_v7 = vmul.f32 0.1, %v1880_v5  ;;  %v3547_v9 = vpop.f32.mrb[62].mxu1  ;;  %3588 = vmatprep.mubr.bf16.mxu1 %v2061_v62  ;;  %v1902_v10 = vmul.f32 0.1, %v3523_v8  ;;  %v1814_v12 = vpop.f32.mrb[63].mxu0  ;;  %3565 = vmatmul.mubr.bf16.vlgmr.msra.gmra.mrb[64].mxu0 %v1945_v59  ;;  %v1909_v14 = vmax.f32 %v3522_v63, %v1901_v2 }
 0x708   :  { %v1918_v11 = vmul.f32 0.1, %v3547_v9  ;;  %v1883_v13 = vpop.f32.mrb[63].mxu1  ;;  %3589 = vmatmul.mubr.bf16.vlgmr.msra.gmra.mrb[64].mxu1 %v2062_v60  ;;  %v1900_v15 = vmul.f32 0.1, %v1814_v12  ;;  %3597 = vmatpush3.bf16.msra.mxu0 %v3809_v34  ;;  %v1925_v17 = vmax.f32 %v3546_v0, %v1917_v3  ;;  %v1907_v21 = vmax.f32 %v1811_v4, %v1899_v6 }
 0x709   :  { %v1916_v16 = vmul.f32 0.1, %v1883_v13  ;;  %3621 = vmatpush3.bf16.msra.mxu1 %v3809_v34  ;;  %v1910_v18 = vmax.f32 %v3523_v8, %v1902_v10  ;;  %3598 = vmatprep.subr.bf16.mxu0 %v3810_v1  ;;  %v1923_v22 = vmax.f32 %v1880_v5, %v1915_v7  ;;  %v3817_v34 = vld [vmem:[%s4060_s3] sm:$0xff]  }
 0x70a   :  { %v1926_v19 = vmax.f32 %v3547_v9, %v1918_v11  ;;  %3622 = vmatprep.subr.bf16.mxu1 %v3810_v1  ;;  %v1908_v23 = vmax.f32 %v1814_v12, %v1900_v15 }
 0x70b   :  { %v1924_v24 = vmax.f32 %v1883_v13, %v1916_v16  ;;  %v1947_v25 = vpack.c.bf16 %v1910_v18, %v1909_v14 }
 0x70c   :  { %v2064_v26 = vpack.c.bf16 %v1926_v19, %v1925_v17  ;;  %v1946_v27 = vpack.c.bf16 %v1908_v23, %v1907_v21  ;;  %3599 = vmatpush3.bf16.msra.mxu0 %v3810_v1 }
 0x70d   :  { %v2063_v28 = vpack.c.bf16 %v1924_v24, %v1923_v22  ;;  %3623 = vmatpush3.bf16.msra.mxu1 %v3810_v1  ;;  %3600 = vmatprep.subr.bf16.mxu0 %v3811_v20  ;;  %v3818_v1 = vld [vmem:[%s4060_s3 + $0x8] sm:$0xff]  }
 0x70e   :  { %3624 = vmatprep.subr.bf16.mxu1 %v3811_v20  ;;  %3568 = vmatprep.mubr.bf16.mxu0 %v1946_v27 }
 0x70f   :  { %3592 = vmatprep.mubr.bf16.mxu1 %v2063_v28  ;;  %3569 = vmatmul.mubr.bf16.gmra.mrb[68].mxu0 %v1947_v25 }
 0x710   :  { %3593 = vmatmul.mubr.bf16.gmra.mrb[68].mxu1 %v2064_v26  ;;  %3601 = vmatpush3.bf16.msra.mxu0 %v3811_v20 }
 0x711   :  { %3625 = vmatpush3.bf16.msra.mxu1 %v3811_v20  ;;  %3602 = vmatprep.subr.bf16.mxu0 %v3812_v29  ;;  %v3819_v20 = vld [vmem:[%s4060_s3 + $0x10] sm:$0xff]  }
 0x712   :  { %3626 = vmatprep.subr.bf16.mxu1 %v3812_v29 }
 0x714   :  { %3603 = vmatpush3.bf16.msra.mxu0 %v3812_v29 }
 0x715   :  { %3627 = vmatpush3.bf16.msra.mxu1 %v3812_v29  ;;  %3604 = vmatprep.subr.bf16.mxu0 %v3813_v30  ;;  %v3820_v29 = vld [vmem:[%s4060_s3 + $0x18] sm:$0xff]  }
 0x716   :  { %3628 = vmatprep.subr.bf16.mxu1 %v3813_v30 }
 0x718   :  { %3605 = vmatpush3.bf16.msra.mxu0 %v3813_v30 }
 0x719   :  { %3629 = vmatpush3.bf16.msra.mxu1 %v3813_v30  ;;  %3606 = vmatprep.subr.bf16.mxu0 %v3814_v31  ;;  %v3821_v30 = vld [vmem:[%s4060_s3 + $0x20] sm:$0xff]  }
 0x71a   :  { %3630 = vmatprep.subr.bf16.mxu1 %v3814_v31 }
 0x71c   :  { %3607 = vmatpush3.bf16.msra.mxu0 %v3814_v31 }
 0x71d   :  { %3631 = vmatpush3.bf16.msra.mxu1 %v3814_v31  ;;  %3608 = vmatprep.subr.bf16.mxu0 %v3815_v32  ;;  %v3822_v31 = vld [vmem:[%s4060_s3 + $0x28] sm:$0xff]  }
 0x71e   :  { %3632 = vmatprep.subr.bf16.mxu1 %v3815_v32 }
 0x720   :  { %3609 = vmatpush3.bf16.msra.mxu0 %v3815_v32 }
 0x721   :  { %3633 = vmatpush3.bf16.msra.mxu1 %v3815_v32  ;;  %3610 = vmatprep.subr.bf16.mxu0 %v3816_v33  ;;  %v3823_v32 = vld [vmem:[%s4060_s3 + $0x30] sm:$0xff]  }
 0x722   :  { %3634 = vmatprep.subr.bf16.mxu1 %v3816_v33 }
 0x724   :  { %3611 = vmatpush3.bf16.msra.mxu0 %v3816_v33 }
 0x725   :  { %3635 = vmatpush3.bf16.msra.mxu1 %v3816_v33  ;;  %3644 = vmatprep.subr.bf16.mxu0 %v3817_v34  ;;  %v3824_v33 = vld [vmem:[%s4060_s3 + $0x38] sm:$0xff]  }
 0x726   :  { %3668 = vmatprep.subr.bf16.mxu1 %v3817_v34 }
 0x7da   :  { %v3566_v35 = vpop.f32.mrb[64].mxu0 }
 0x7db   :  { %v3590_v36 = vpop.f32.mrb[64].mxu1  ;;  %v2132_v37 = vmul.f32 0.1, %v3566_v35  ;;  %v2030_v39 = vpop.f32.mrb[65].mxu0 }
 0x7dc   :  { %v2148_v38 = vmul.f32 0.1, %v3590_v36  ;;  %v2099_v40 = vpop.f32.mrb[65].mxu1  ;;  %v2130_v41 = vmul.f32 0.1, %v2030_v39  ;;  %v3567_v43 = vpop.f32.mrb[66].mxu0 }
 0x7dd   :  { %v2146_v42 = vmul.f32 0.1, %v2099_v40  ;;  %v3591_v44 = vpop.f32.mrb[66].mxu1  ;;  %v2133_v45 = vmul.f32 0.1, %v3567_v43  ;;  %v2033_v47 = vpop.f32.mrb[67].mxu0  ;;  %v2140_v51 = vmax.f32 %v3566_v35, %v2132_v37 }
 0x7de   :  { %v2149_v46 = vmul.f32 0.1, %v3591_v44  ;;  %v2102_v48 = vpop.f32.mrb[67].mxu1  ;;  %v2131_v49 = vmul.f32 0.1, %v2033_v47  ;;  %v2156_v52 = vmax.f32 %v3590_v36, %v2148_v38  ;;  %v2138_v55 = vmax.f32 %v2030_v39, %v2130_v41 }
 0x7df   :  { %v2147_v50 = vmul.f32 0.1, %v2102_v48  ;;  %v2141_v53 = vmax.f32 %v3567_v43, %v2133_v45  ;;  %v2154_v56 = vmax.f32 %v2099_v40, %v2146_v42 }
 0x7e0   :  { %v2157_v54 = vmax.f32 %v3591_v44, %v2149_v46  ;;  %v2139_v57 = vmax.f32 %v2033_v47, %v2131_v49 }
 0x7e1   :  { %v2155_v58 = vmax.f32 %v2102_v48, %v2147_v50  ;;  %v2180_v59 = vpack.c.bf16 %v2141_v53, %v2140_v51 }
 0x7e2   :  { %v2297_v60 = vpack.c.bf16 %v2157_v54, %v2156_v52  ;;  %v2179_v61 = vpack.c.bf16 %v2139_v57, %v2138_v55  ;;  %v3570_v63 = vpop.f32.mrb[68].mxu0 }
 0x7e3   :  { %v2296_v62 = vpack.c.bf16 %v2155_v58, %v2154_v56  ;;  %v3594_v0 = vpop.f32.mrb[68].mxu1  ;;  %v2136_v2 = vmul.f32 0.1, %v3570_v63  ;;  %v2046_v4 = vpop.f32.mrb[69].mxu0 }
 0x7e4   :  { %v2152_v3 = vmul.f32 0.1, %v3594_v0  ;;  %v2115_v5 = vpop.f32.mrb[69].mxu1  ;;  %v2134_v6 = vmul.f32 0.1, %v2046_v4  ;;  %v3571_v8 = vpop.f32.mrb[70].mxu0  ;;  %3612 = vmatprep.mubr.bf16.mxu0 %v2179_v61 }
 0x7e5   :  { %v2150_v7 = vmul.f32 0.1, %v2115_v5  ;;  %v3595_v9 = vpop.f32.mrb[70].mxu1  ;;  %3636 = vmatprep.mubr.bf16.mxu1 %v2296_v62  ;;  %v2137_v10 = vmul.f32 0.1, %v3571_v8  ;;  %v2049_v12 = vpop.f32.mrb[71].mxu0  ;;  %3613 = vmatmul.mubr.bf16.vlgmr.msra.gmra.mrb[72].mxu0 %v2180_v59  ;;  %v2144_v14 = vmax.f32 %v3570_v63, %v2136_v2 }
 0x7e6   :  { %v2153_v11 = vmul.f32 0.1, %v3595_v9  ;;  %v2118_v13 = vpop.f32.mrb[71].mxu1  ;;  %3637 = vmatmul.mubr.bf16.vlgmr.msra.gmra.mrb[72].mxu1 %v2297_v60  ;;  %v2135_v15 = vmul.f32 0.1, %v2049_v12  ;;  %3645 = vmatpush3.bf16.msra.mxu0 %v3817_v34  ;;  %v2160_v17 = vmax.f32 %v3594_v0, %v2152_v3  ;;  %v2142_v21 = vmax.f32 %v2046_v4, %v2134_v6 }
 0x7e7   :  { %v2151_v16 = vmul.f32 0.1, %v2118_v13  ;;  %3669 = vmatpush3.bf16.msra.mxu1 %v3817_v34  ;;  %v2145_v18 = vmax.f32 %v3571_v8, %v2137_v10  ;;  %3646 = vmatprep.subr.bf16.mxu0 %v3818_v1  ;;  %v2158_v22 = vmax.f32 %v2115_v5, %v2150_v7  ;;  %v3825_v34 = vld [vmem:[%s4061_s4] sm:$0xff]  }
 0x7e8   :  { %v2161_v19 = vmax.f32 %v3595_v9, %v2153_v11  ;;  %3670 = vmatprep.subr.bf16.mxu1 %v3818_v1  ;;  %v2143_v23 = vmax.f32 %v2049_v12, %v2135_v15 }
 0x7e9   :  { %v2159_v24 = vmax.f32 %v2118_v13, %v2151_v16  ;;  %v2182_v25 = vpack.c.bf16 %v2145_v18, %v2144_v14 }
 0x7ea   :  { %v2299_v26 = vpack.c.bf16 %v2161_v19, %v2160_v17  ;;  %v2181_v27 = vpack.c.bf16 %v2143_v23, %v2142_v21  ;;  %3647 = vmatpush3.bf16.msra.mxu0 %v3818_v1 }
 0x7eb   :  { %v2298_v28 = vpack.c.bf16 %v2159_v24, %v2158_v22  ;;  %3671 = vmatpush3.bf16.msra.mxu1 %v3818_v1  ;;  %3648 = vmatprep.subr.bf16.mxu0 %v3819_v20  ;;  %v3826_v1 = vld [vmem:[%s4061_s4 + $0x8] sm:$0xff]  }
 0x7ec   :  { %3672 = vmatprep.subr.bf16.mxu1 %v3819_v20  ;;  %3616 = vmatprep.mubr.bf16.mxu0 %v2181_v27 }
 0x7ed   :  { %3640 = vmatprep.mubr.bf16.mxu1 %v2298_v28  ;;  %3617 = vmatmul.mubr.bf16.gmra.mrb[76].mxu0 %v2182_v25 }
 0x7ee   :  { %3641 = vmatmul.mubr.bf16.gmra.mrb[76].mxu1 %v2299_v26  ;;  %3649 = vmatpush3.bf16.msra.mxu0 %v3819_v20 }
 0x7ef   :  { %3673 = vmatpush3.bf16.msra.mxu1 %v3819_v20  ;;  %3650 = vmatprep.subr.bf16.mxu0 %v3820_v29  ;;  %v3827_v20 = vld [vmem:[%s4061_s4 + $0x10] sm:$0xff]  }
 0x7f0   :  { %3674 = vmatprep.subr.bf16.mxu1 %v3820_v29 }
 0x7f2   :  { %3651 = vmatpush3.bf16.msra.mxu0 %v3820_v29 }
 0x7f3   :  { %3675 = vmatpush3.bf16.msra.mxu1 %v3820_v29  ;;  %3652 = vmatprep.subr.bf16.mxu0 %v3821_v30  ;;  %v3828_v29 = vld [vmem:[%s4061_s4 + $0x18] sm:$0xff]  }
 0x7f4   :  { %3676 = vmatprep.subr.bf16.mxu1 %v3821_v30 }
 0x7f6   :  { %3653 = vmatpush3.bf16.msra.mxu0 %v3821_v30 }
 0x7f7   :  { %3677 = vmatpush3.bf16.msra.mxu1 %v3821_v30  ;;  %3654 = vmatprep.subr.bf16.mxu0 %v3822_v31  ;;  %v3829_v30 = vld [vmem:[%s4061_s4 + $0x20] sm:$0xff]  }
 0x7f8   :  { %3678 = vmatprep.subr.bf16.mxu1 %v3822_v31 }
 0x7fa   :  { %3655 = vmatpush3.bf16.msra.mxu0 %v3822_v31 }
 0x7fb   :  { %3679 = vmatpush3.bf16.msra.mxu1 %v3822_v31  ;;  %3656 = vmatprep.subr.bf16.mxu0 %v3823_v32  ;;  %v3830_v31 = vld [vmem:[%s4061_s4 + $0x28] sm:$0xff]  }
 0x7fc   :  { %3680 = vmatprep.subr.bf16.mxu1 %v3823_v32 }
 0x7fe   :  { %3657 = vmatpush3.bf16.msra.mxu0 %v3823_v32 }
 0x7ff   :  { %3681 = vmatpush3.bf16.msra.mxu1 %v3823_v32  ;;  %3658 = vmatprep.subr.bf16.mxu0 %v3824_v33  ;;  %v3831_v32 = vld [vmem:[%s4061_s4 + $0x30] sm:$0xff]  }
 0x800   :  { %3682 = vmatprep.subr.bf16.mxu1 %v3824_v33 }
 0x802   :  { %3659 = vmatpush3.bf16.msra.mxu0 %v3824_v33 }
 0x803   :  { %3683 = vmatpush3.bf16.msra.mxu1 %v3824_v33  ;;  %3692 = vmatprep.subr.bf16.mxu0 %v3825_v34  ;;  %v3832_v33 = vld [vmem:[%s4061_s4 + $0x38] sm:$0xff]  }
 0x804   :  { %3716 = vmatprep.subr.bf16.mxu1 %v3825_v34 }
 0x8b8   :  { %v3614_v35 = vpop.f32.mrb[72].mxu0 }
 0x8b9   :  { %v3638_v36 = vpop.f32.mrb[72].mxu1  ;;  %v2367_v37 = vmul.f32 0.1, %v3614_v35  ;;  %v2265_v39 = vpop.f32.mrb[73].mxu0 }
 0x8ba   :  { %v2383_v38 = vmul.f32 0.1, %v3638_v36  ;;  %v2334_v40 = vpop.f32.mrb[73].mxu1  ;;  %v2365_v41 = vmul.f32 0.1, %v2265_v39  ;;  %v3615_v43 = vpop.f32.mrb[74].mxu0 }
 0x8bb   :  { %v2381_v42 = vmul.f32 0.1, %v2334_v40  ;;  %v3639_v44 = vpop.f32.mrb[74].mxu1  ;;  %v2368_v45 = vmul.f32 0.1, %v3615_v43  ;;  %v2268_v47 = vpop.f32.mrb[75].mxu0  ;;  %v2375_v51 = vmax.f32 %v3614_v35, %v2367_v37 }
 0x8bc   :  { %v2384_v46 = vmul.f32 0.1, %v3639_v44  ;;  %v2337_v48 = vpop.f32.mrb[75].mxu1  ;;  %v2366_v49 = vmul.f32 0.1, %v2268_v47  ;;  %v2391_v52 = vmax.f32 %v3638_v36, %v2383_v38  ;;  %v2373_v55 = vmax.f32 %v2265_v39, %v2365_v41 }
 0x8bd   :  { %v2382_v50 = vmul.f32 0.1, %v2337_v48  ;;  %v2376_v53 = vmax.f32 %v3615_v43, %v2368_v45  ;;  %v2389_v56 = vmax.f32 %v2334_v40, %v2381_v42 }
 0x8be   :  { %v2392_v54 = vmax.f32 %v3639_v44, %v2384_v46  ;;  %v2374_v57 = vmax.f32 %v2268_v47, %v2366_v49 }
 0x8bf   :  { %v2390_v58 = vmax.f32 %v2337_v48, %v2382_v50  ;;  %v2398_v59 = vpack.c.bf16 %v2376_v53, %v2375_v51 }
 0x8c0   :  { %v2515_v60 = vpack.c.bf16 %v2392_v54, %v2391_v52  ;;  %v2397_v61 = vpack.c.bf16 %v2374_v57, %v2373_v55  ;;  %v3618_v63 = vpop.f32.mrb[76].mxu0 }
 0x8c1   :  { %v2514_v62 = vpack.c.bf16 %v2390_v58, %v2389_v56  ;;  %v3642_v0 = vpop.f32.mrb[76].mxu1  ;;  %v2371_v2 = vmul.f32 0.1, %v3618_v63  ;;  %v2281_v4 = vpop.f32.mrb[77].mxu0 }
 0x8c2   :  { %v2387_v3 = vmul.f32 0.1, %v3642_v0  ;;  %v2350_v5 = vpop.f32.mrb[77].mxu1  ;;  %v2369_v6 = vmul.f32 0.1, %v2281_v4  ;;  %v3619_v8 = vpop.f32.mrb[78].mxu0  ;;  %3660 = vmatprep.mubr.bf16.mxu0 %v2397_v61 }
 0x8c3   :  { %v2385_v7 = vmul.f32 0.1, %v2350_v5  ;;  %v3643_v9 = vpop.f32.mrb[78].mxu1  ;;  %3684 = vmatprep.mubr.bf16.mxu1 %v2514_v62  ;;  %v2372_v10 = vmul.f32 0.1, %v3619_v8  ;;  %v2284_v12 = vpop.f32.mrb[79].mxu0  ;;  %3661 = vmatmul.mubr.bf16.vlgmr.msra.gmra.mrb[80].mxu0 %v2398_v59  ;;  %v2379_v14 = vmax.f32 %v3618_v63, %v2371_v2 }
 0x8c4   :  { %v2388_v11 = vmul.f32 0.1, %v3643_v9  ;;  %v2353_v13 = vpop.f32.mrb[79].mxu1  ;;  %3685 = vmatmul.mubr.bf16.vlgmr.msra.gmra.mrb[80].mxu1 %v2515_v60  ;;  %v2370_v15 = vmul.f32 0.1, %v2284_v12  ;;  %3693 = vmatpush3.bf16.msra.mxu0 %v3825_v34  ;;  %v2395_v17 = vmax.f32 %v3642_v0, %v2387_v3  ;;  %v2377_v21 = vmax.f32 %v2281_v4, %v2369_v6 }
 0x8c5   :  { %v2386_v16 = vmul.f32 0.1, %v2353_v13  ;;  %3717 = vmatpush3.bf16.msra.mxu1 %v3825_v34  ;;  %v2380_v18 = vmax.f32 %v3619_v8, %v2372_v10  ;;  %3694 = vmatprep.subr.bf16.mxu0 %v3826_v1  ;;  %v2393_v22 = vmax.f32 %v2350_v5, %v2385_v7 }
 0x8c6   :  { %v2396_v19 = vmax.f32 %v3643_v9, %v2388_v11  ;;  %3718 = vmatprep.subr.bf16.mxu1 %v3826_v1  ;;  %v2378_v23 = vmax.f32 %v2284_v12, %v2370_v15 }
 0x8c7   :  { %v2394_v24 = vmax.f32 %v2353_v13, %v2386_v16  ;;  %v2400_v25 = vpack.c.bf16 %v2380_v18, %v2379_v14 }
 0x8c8   :  { %v2517_v26 = vpack.c.bf16 %v2396_v19, %v2395_v17  ;;  %v2399_v27 = vpack.c.bf16 %v2378_v23, %v2377_v21  ;;  %3695 = vmatpush3.bf16.msra.mxu0 %v3826_v1 }
 0x8c9   :  { %v2516_v28 = vpack.c.bf16 %v2394_v24, %v2393_v22  ;;  %3719 = vmatpush3.bf16.msra.mxu1 %v3826_v1  ;;  %3696 = vmatprep.subr.bf16.mxu0 %v3827_v20 }
 0x8ca   :  { %3720 = vmatprep.subr.bf16.mxu1 %v3827_v20  ;;  %3664 = vmatprep.mubr.bf16.mxu0 %v2399_v27 }
 0x8cb   :  { %3688 = vmatprep.mubr.bf16.mxu1 %v2516_v28  ;;  %3665 = vmatmul.mubr.bf16.gmra.mrb[84].mxu0 %v2400_v25 }
 0x8cc   :  { %3689 = vmatmul.mubr.bf16.gmra.mrb[84].mxu1 %v2517_v26  ;;  %3697 = vmatpush3.bf16.msra.mxu0 %v3827_v20 }
 0x8cd   :  { %3721 = vmatpush3.bf16.msra.mxu1 %v3827_v20  ;;  %3698 = vmatprep.subr.bf16.mxu0 %v3828_v29 }
 0x8ce   :  { %3722 = vmatprep.subr.bf16.mxu1 %v3828_v29 }
 0x8d0   :  { %3699 = vmatpush3.bf16.msra.mxu0 %v3828_v29 }
 0x8d1   :  { %3723 = vmatpush3.bf16.msra.mxu1 %v3828_v29  ;;  %3700 = vmatprep.subr.bf16.mxu0 %v3829_v30 }
 0x8d2   :  { %3724 = vmatprep.subr.bf16.mxu1 %v3829_v30 }
 0x8d4   :  { %3701 = vmatpush3.bf16.msra.mxu0 %v3829_v30 }
 0x8d5   :  { %3725 = vmatpush3.bf16.msra.mxu1 %v3829_v30  ;;  %3702 = vmatprep.subr.bf16.mxu0 %v3830_v31 }
 0x8d6   :  { %3726 = vmatprep.subr.bf16.mxu1 %v3830_v31 }
 0x8d8   :  { %3703 = vmatpush3.bf16.msra.mxu0 %v3830_v31 }
 0x8d9   :  { %3727 = vmatpush3.bf16.msra.mxu1 %v3830_v31  ;;  %3704 = vmatprep.subr.bf16.mxu0 %v3831_v32 }
 0x8da   :  { %3728 = vmatprep.subr.bf16.mxu1 %v3831_v32 }
 0x8dc   :  { %3705 = vmatpush3.bf16.msra.mxu0 %v3831_v32 }
 0x8dd   :  { %3729 = vmatpush3.bf16.msra.mxu1 %v3831_v32  ;;  %3706 = vmatprep.subr.bf16.mxu0 %v3832_v33 }
 0x8de   :  { %3730 = vmatprep.subr.bf16.mxu1 %v3832_v33 }
 0x8e0   :  { %3707 = vmatpush3.bf16.msra.mxu0 %v3832_v33 }
 0x8e1   :  { %3731 = vmatpush3.bf16.msra.mxu1 %v3832_v33 }
 0x996   :  { %v3662_v34 = vpop.f32.mrb[80].mxu0 }
 0x997   :  { %v3686_v35 = vpop.f32.mrb[80].mxu1  ;;  %v2585_v36 = vmul.f32 0.1, %v3662_v34  ;;  %v2483_v38 = vpop.f32.mrb[81].mxu0 }
 0x998   :  { %v2601_v37 = vmul.f32 0.1, %v3686_v35  ;;  %v2552_v39 = vpop.f32.mrb[81].mxu1  ;;  %v2583_v40 = vmul.f32 0.1, %v2483_v38  ;;  %v3663_v42 = vpop.f32.mrb[82].mxu0 }
 0x999   :  { %v2599_v41 = vmul.f32 0.1, %v2552_v39  ;;  %v3687_v43 = vpop.f32.mrb[82].mxu1  ;;  %v2586_v44 = vmul.f32 0.1, %v3663_v42  ;;  %v2486_v46 = vpop.f32.mrb[83].mxu0  ;;  %v2593_v50 = vmax.f32 %v3662_v34, %v2585_v36 }
 0x99a   :  { %v2602_v45 = vmul.f32 0.1, %v3687_v43  ;;  %v2555_v47 = vpop.f32.mrb[83].mxu1  ;;  %v2584_v48 = vmul.f32 0.1, %v2486_v46  ;;  %v2609_v51 = vmax.f32 %v3686_v35, %v2601_v37  ;;  %v2591_v54 = vmax.f32 %v2483_v38, %v2583_v40 }
 0x99b   :  { %v2600_v49 = vmul.f32 0.1, %v2555_v47  ;;  %v2594_v52 = vmax.f32 %v3663_v42, %v2586_v44  ;;  %v2607_v55 = vmax.f32 %v2552_v39, %v2599_v41 }
 0x99c   :  { %v2610_v53 = vmax.f32 %v3687_v43, %v2602_v45  ;;  %v2592_v56 = vmax.f32 %v2486_v46, %v2584_v48 }
 0x99d   :  { %v2608_v57 = vmax.f32 %v2555_v47, %v2600_v49  ;;  %v2616_v58 = vpack.c.bf16 %v2594_v52, %v2593_v50 }
 0x99e   :  { %v2733_v59 = vpack.c.bf16 %v2610_v53, %v2609_v51  ;;  %v2615_v60 = vpack.c.bf16 %v2592_v56, %v2591_v54  ;;  %v3666_v62 = vpop.f32.mrb[84].mxu0 }
 0x99f   :  { %v2732_v61 = vpack.c.bf16 %v2608_v57, %v2607_v55  ;;  %v3690_v63 = vpop.f32.mrb[84].mxu1  ;;  %v2589_v0 = vmul.f32 0.1, %v3666_v62  ;;  %v2499_v2 = vpop.f32.mrb[85].mxu0 }
 0x9a0   :  { %v2605_v1 = vmul.f32 0.1, %v3690_v63  ;;  %v2568_v3 = vpop.f32.mrb[85].mxu1  ;;  %v2587_v4 = vmul.f32 0.1, %v2499_v2  ;;  %v3667_v6 = vpop.f32.mrb[86].mxu0  ;;  %3708 = vmatprep.mubr.bf16.mxu0 %v2615_v60 }
 0x9a1   :  { %v2603_v5 = vmul.f32 0.1, %v2568_v3  ;;  %v3691_v7 = vpop.f32.mrb[86].mxu1  ;;  %3732 = vmatprep.mubr.bf16.mxu1 %v2732_v61  ;;  %v2590_v8 = vmul.f32 0.1, %v3667_v6  ;;  %v2502_v10 = vpop.f32.mrb[87].mxu0  ;;  %3709 = vmatmul.mubr.bf16.vlgmr.msra.gmra.mrb[88].mxu0 %v2616_v58  ;;  %v2597_v14 = vmax.f32 %v3666_v62, %v2589_v0 }
 0x9a2   :  { %v2606_v9 = vmul.f32 0.1, %v3691_v7  ;;  %v2571_v11 = vpop.f32.mrb[87].mxu1  ;;  %3733 = vmatmul.mubr.bf16.vlgmr.msra.gmra.mrb[88].mxu1 %v2733_v59  ;;  %v2588_v12 = vmul.f32 0.1, %v2502_v10  ;;  %v2613_v15 = vmax.f32 %v3690_v63, %v2605_v1  ;;  %v2595_v18 = vmax.f32 %v2499_v2, %v2587_v4 }
 0x9a3   :  { %v2604_v13 = vmul.f32 0.1, %v2571_v11  ;;  %v2598_v16 = vmax.f32 %v3667_v6, %v2590_v8  ;;  %v2611_v19 = vmax.f32 %v2568_v3, %v2603_v5 }
 0x9a4   :  { %v2614_v17 = vmax.f32 %v3691_v7, %v2606_v9  ;;  %v2596_v20 = vmax.f32 %v2502_v10, %v2588_v12 }
 0x9a5   :  { %v2612_v21 = vmax.f32 %v2571_v11, %v2604_v13  ;;  %v2618_v22 = vpack.c.bf16 %v2598_v16, %v2597_v14 }
 0x9a6   :  { %v2735_v23 = vpack.c.bf16 %v2614_v17, %v2613_v15  ;;  %v2617_v24 = vpack.c.bf16 %v2596_v20, %v2595_v18 }
 0x9a7   :  { %v2734_v25 = vpack.c.bf16 %v2612_v21, %v2611_v19 }
 0x9a8   :  { %3712 = vmatprep.mubr.bf16.mxu0 %v2617_v24 }
 0x9a9   :  { %3736 = vmatprep.mubr.bf16.mxu1 %v2734_v25  ;;  %3713 = vmatmul.mubr.bf16.gmra.mrb[92].mxu0 %v2618_v22 }
 0x9aa   :  { %3737 = vmatmul.mubr.bf16.gmra.mrb[92].mxu1 %v2735_v23 }
 0xa74   :  { %v3710_v26 = vpop.f32.mrb[88].mxu0 }
 0xa75   :  { %v3734_v27 = vpop.f32.mrb[88].mxu1  ;;  %2803 = vst [vmem:[%s4062_s5 + $0x10] sm:$0xff] %v3710_v26  ;;  %v2701_v28 = vpop.f32.mrb[89].mxu0 }
 0xa76   :  { %2811 = vst [vmem:[%s4062_s5 + $0x50] sm:$0xff] %v3734_v27  ;;  %v2770_v29 = vpop.f32.mrb[89].mxu1  ;;  %2801 = vst [vmem:[%s4062_s5] sm:$0xff] %v2701_v28  ;;  %v3711_v30 = vpop.f32.mrb[90].mxu0 }
 0xa77   :  { %2809 = vst [vmem:[%s4062_s5 + $0x40] sm:$0xff] %v2770_v29  ;;  %v3735_v31 = vpop.f32.mrb[90].mxu1  ;;  %2804 = vst [vmem:[%s4062_s5 + $0x18] sm:$0xff] %v3711_v30  ;;  %v2704_v32 = vpop.f32.mrb[91].mxu0 }
 0xa78   :  { %2812 = vst [vmem:[%s4062_s5 + $0x58] sm:$0xff] %v3735_v31  ;;  %v2773_v33 = vpop.f32.mrb[91].mxu1  ;;  %2802 = vst [vmem:[%s4062_s5 + $0x8] sm:$0xff] %v2704_v32 }
 0xa79   :  { %2810 = vst [vmem:[%s4062_s5 + $0x48] sm:$0xff] %v2773_v33 }
 0xa7c   :  { %v3714_v34 = vpop.f32.mrb[92].mxu0 }
 0xa7d   :  { %v3738_v35 = vpop.f32.mrb[92].mxu1  ;;  %2807 = vst [vmem:[%s4062_s5 + $0x30] sm:$0xff] %v3714_v34  ;;  %v2717_v36 = vpop.f32.mrb[93].mxu0 }
 0xa7e   :  { %2815 = vst [vmem:[%s4062_s5 + $0x70] sm:$0xff] %v3738_v35  ;;  %v2786_v37 = vpop.f32.mrb[93].mxu1  ;;  %2805 = vst [vmem:[%s4062_s5 + $0x20] sm:$0xff] %v2717_v36  ;;  %v3715_v38 = vpop.f32.mrb[94].mxu0 }
 0xa7f   :  { %2813 = vst [vmem:[%s4062_s5 + $0x60] sm:$0xff] %v2786_v37  ;;  %v3739_v39 = vpop.f32.mrb[94].mxu1  ;;  %2808 = vst [vmem:[%s4062_s5 + $0x38] sm:$0xff] %v3715_v38  ;;  %v2720_v40 = vpop.f32.mrb[95].mxu0 }
 0xa80   :  { %2816 = vst [vmem:[%s4062_s5 + $0x78] sm:$0xff] %v3739_v39  ;;  %v2789_v41 = vpop.f32.mrb[95].mxu1  ;;  %2806 = vst [vmem:[%s4062_s5 + $0x28] sm:$0xff] %v2720_v40 }
 0xa81   :  { %2814 = vst [vmem:[%s4062_s5 + $0x68] sm:$0xff] %v2789_v41 }
 0xa82   :  { %2821 = vsyncpa [#allocation3], 1 }

</bundles_post_ra>
